<compile_context>
chip_gen: v7x
topology: tpu7x:2x2x1
jax: 0.10.0
libtpu: 0.0.40
codegen_flags: <defaults>
</compile_context>

<pallas_src>
import functools

import jax
import jax.numpy as jnp
from jax.experimental import pallas as pl
from jax.experimental.pallas import tpu as pltpu

# ---------------- model hyper-parameters (small, consistent with forward) ----
B = 2              # batch
S = 8              # sequence length
H = 32             # args.hidden_size
NH = 2             # attention heads
HD = H // NH       # head dim
FFN = 4 * H        # feed-forward inner dim (= 128)
VOCAB = 64         # synthetic vocab
LABELS = 2         # self.labels_num
HEAD_PAD = 128     # lane-dense padded width for fused QKV / FFN / head weights
POOLING = "first"  # args.pooling not in {mean,max,last} -> CLS (output[:, 0, :])
NEG = -10000.0     # additive mask value (matches BERT-style masking)

# rows of the packed (8, H) vector parameter
LN0_G, LN0_B, B_O, LN1_G, LN1_B, B_FFN2, LN2_G, LN2_B = range(8)
# rows of the packed (4, 128) vector parameter
B_QKV, B_FFN1, B_H1, B_H2 = range(4)


# ----------------------------- kernel helpers --------------------------------
def _layernorm(x, g, b, eps=1e-12):
    mu = jnp.mean(x, axis=-1, keepdims=True)
    var = jnp.mean((x - mu) ** 2, axis=-1, keepdims=True)
    return (x - mu) * jax.lax.rsqrt(var + eps) * g + b


def _gelu(x):
    # TODO(synk): PyTorch nn.GELU default is the erf form; tanh approx used here.
    return 0.5 * x * (1.0 + jnp.tanh(0.7978845608028654 * (x + 0.044715 * x * x * x)))


# ------------------------------ fused kernel ----------------------------------
def dann_kernel(x_ref, bias_ref, pool_ref,
                wqkv_ref, wo_ref, wffn1_ref, wffn2_ref,
                wh1_ref, wh2_ref, vech_ref, vec128_ref,
                out_ref, *, pooling):
    """Whole forward in one grid step.

    x_ref   : (M, H)   flat activations, M = n_seq * S (group+batch folded in)
    bias_ref: (M, M)   block-diagonal additive attention bias (mask + vm)
    pool_ref: (n, M)   pooling selection/averaging matrix
    out_ref : (n, 128) lane-dense logits slab; cols 0:2 = cc, cols 2:4 = dc
    """
    x = x_ref[...]                                # (M, H)
    bias = bias_ref[...]                          # (M, M)
    m_rows = x.shape[0]
    n_seq = m_rows // S

    # embedding LayerNorm
    x = _layernorm(x, vech_ref[LN0_G], vech_ref[LN0_B])

    # ---- fused QKV projection: ONE lane-dense matmul -------------------------
    qkv = jnp.dot(x, wqkv_ref[...], preferred_element_type=jnp.float32) \
        + vec128_ref[B_QKV]                       # (M, 128): [ Q | K | V | pad ]

    scale = 1.0 / (HD ** 0.5)
    ctx_heads = []
    for h in range(NH):                           # static unroll (NH = 2)
        qh = qkv[:, 0 * H + h * HD:0 * H + (h + 1) * HD]     # (M, HD)
        kh = qkv[:, 1 * H + h * HD:1 * H + (h + 1) * HD]
        vh = qkv[:, 2 * H + h * HD:2 * H + (h + 1) * HD]
        # flat (M, M) scores; cross-sequence positions killed by block-diag bias
        s = jnp.einsum("md,nd->mn", qh, kh,
                       preferred_element_type=jnp.float32) * scale + bias
        s = s - jnp.max(s, axis=-1, keepdims=True)
        p = jnp.exp(s)
        p = p * pl.reciprocal(jnp.sum(p, axis=-1, keepdims=True), approx=True)
        ctx_heads.append(jnp.dot(p, vh, preferred_element_type=jnp.float32))
    ctx = jnp.concatenate(ctx_heads, axis=-1)     # (M, H)
    attn = jnp.dot(ctx, wo_ref[...], preferred_element_type=jnp.float32) \
        + vech_ref[B_O]

    x = _layernorm(x + attn, vech_ref[LN1_G], vech_ref[LN1_B])

    # ---- feed-forward ----
    hmid = _gelu(jnp.dot(x, wffn1_ref[...], preferred_element_type=jnp.float32)
                 + vec128_ref[B_FFN1])
    ffn = jnp.dot(hmid, wffn2_ref[...], preferred_element_type=jnp.float32) \
        + vech_ref[B_FFN2]
    x = _layernorm(x + ffn, vech_ref[LN2_G], vech_ref[LN2_B])

    # ---- pooling ----
    if pooling == "max":
        feat = jnp.max(x.reshape(n_seq, S, H), axis=1)        # rare path
    else:
        # first / last / mean as a tiny selection/averaging matmul
        feat = jnp.dot(pool_ref[...], x, preferred_element_type=jnp.float32)

    # ---- fused class + domain classifier heads (lane-dense 128-wide) ----
    hh = jnp.maximum(
        jnp.dot(feat, wh1_ref[...], preferred_element_type=jnp.float32)
        + vec128_ref[B_H1], 0.0)
    logits = jnp.dot(hh, wh2_ref[...], preferred_element_type=jnp.float32) \
        + vec128_ref[B_H2]
    out_ref[...] = logits                         # (n_seq, 128)


# ------------------------------- wrappers --------------------------------------
def _full_spec(shape):
    n = len(shape)
    return pl.BlockSpec(shape, lambda g, _n=n: (0,) * _n)


def run_dann(x_flat, bias_flat, pool_mat, p, pooling):
    """x_flat: (M, H), bias_flat: (M, M), pool_mat: (n, M) -> (n, 128) logits."""
    n_seq = pool_mat.shape[0]
    param_list = [p["w_qkv"], p["w_o"], p["w_ffn1"], p["w_ffn2"],
                  p["w_heads1"], p["w_heads2"], p["vec_h"], p["vec_128"]]
    args = [x_flat, bias_flat, pool_mat] + param_list
    in_specs = [_full_spec(a.shape) for a in args]

    kern = functools.partial(dann_kernel, pooling=pooling)
    return pl.pallas_call(
        kern,
        out_shape=jax.ShapeDtypeStruct((n_seq, HEAD_PAD), jnp.float32),
        grid=(1,),
        in_specs=in_specs,
        out_specs=_full_spec((n_seq, HEAD_PAD)),
        compiler_params=pltpu.CompilerParams(dimension_semantics=("arbitrary",)),
    )(*args)


# --------------------------- parameter construction ---------------------------
def init_params(key):
    def nrm(k, shape, scale=0.02):
        return scale * jax.random.normal(k, shape, dtype=jnp.float32)

    keys = jax.random.split(key, 12)
    p = {}
    p["word_emb"] = nrm(keys[0], (VOCAB, H))
    p["pos_emb"] = nrm(keys[1], (S, H))

    wq, wk, wv = nrm(keys[2], (H, H)), nrm(keys[3], (H, H)), nrm(keys[4], (H, H))
    # lane-dense fused QKV slab: cols 0:H = Wq, H:2H = Wk, 2H:3H = Wv, rest pad
    w_qkv = jnp.zeros((H, HEAD_PAD), jnp.float32)
    w_qkv = w_qkv.at[:, 0:H].set(wq).at[:, H:2 * H].set(wk).at[:, 2 * H:3 * H].set(wv)
    p["w_qkv"] = w_qkv
    p["w_o"] = nrm(keys[5], (H, H))

    # packed (8, H) vectors: ln0 g/b, bo, ln1 g/b, b_ffn2, ln2 g/b
    p["vec_h"] = jnp.stack([
        jnp.ones((H,)), jnp.zeros((H,)),      # ln0 gamma, beta
        jnp.zeros((H,)),                      # attention output bias
        jnp.ones((H,)), jnp.zeros((H,)),      # ln1 gamma, beta
        jnp.zeros((H,)),                      # ffn output bias
        jnp.ones((H,)), jnp.zeros((H,)),      # ln2 gamma, beta
    ], axis=0).astype(jnp.float32)

    p["w_ffn1"] = nrm(keys[6], (H, FFN))
    p["w_ffn2"] = nrm(keys[7], (FFN, H))

    # classifier heads: cc = Linear(H,H)-ReLU-Linear(H,2); dc likewise
    cc_w1, cc_w2 = nrm(keys[8], (H, H)), nrm(keys[9], (H, LABELS))
    dc_w1, dc_w2 = nrm(keys[10], (H, H)), nrm(keys[11], (H, 2))
    w_h1 = jnp.zeros((H, HEAD_PAD), jnp.float32)
    w_h1 = w_h1.at[:, 0:H].set(cc_w1).at[:, H:2 * H].set(dc_w1)
    w_h2 = jnp.zeros((HEAD_PAD, HEAD_PAD), jnp.float32)
    w_h2 = w_h2.at[0:H, 0:LABELS].set(cc_w2)
    w_h2 = w_h2.at[H:2 * H, LABELS:LABELS + 2].set(dc_w2)
    p["w_heads1"] = w_h1
    p["w_heads2"] = w_h2

    # packed (4, 128) vectors: fused QKV bias, ffn1 bias, head-1 bias, head-2 bias
    p["vec_128"] = jnp.zeros((4, 128), jnp.float32)
    return p


# ------------------------- wrapper-side layout plumbing ------------------------
def embed_and_bias(params, input_ids, masks, pos, vm):
    if pos is None:
        pos = jnp.broadcast_to(jnp.arange(S, dtype=jnp.int32), (B, S))
    tok = jnp.take(params["word_emb"], input_ids, axis=0)        # (B,S,H)
    pemb = jnp.take(params["pos_emb"], pos, axis=0)              # (B,S,H)
    x_emb = (tok + pemb).astype(jnp.float32)
    if vm is not None:
        bias = (1.0 - vm.astype(jnp.float32)) * NEG              # (B,S,S)
    else:
        bias = (1.0 - masks.astype(jnp.float32))[:, None, :] * NEG
        bias = jnp.broadcast_to(bias, (B, S, S))
    return x_emb, bias


def build_flat_bias(per_seq_bias):
    """(n, S, S) per-sequence additive bias -> (n*S, n*S) block-diagonal bias."""
    n = per_seq_bias.shape[0]
    eye = jnp.eye(n, dtype=jnp.float32)[:, None, :, None]             # (n,1,n,1)
    full = per_seq_bias[:, :, None, :] * eye + (1.0 - eye) * NEG      # (n,S,n,S)
    return full.reshape(n * S, n * S)


def build_pool_matrix(n, pooling):
    if pooling == "mean":
        vec = jnp.full((S,), 1.0 / S, jnp.float32)
    elif pooling == "last":
        vec = jnp.zeros((S,), jnp.float32).at[S - 1].set(1.0)
    else:  # CLS / first (also a harmless dummy for the "max" fallback path)
        vec = jnp.zeros((S,), jnp.float32).at[0].set(1.0)
    return jnp.kron(jnp.eye(n, dtype=jnp.float32), vec[None, :])      # (n, n*S)


# ------------------------------- forward --------------------------------------
def dann_forward(params, input_ids, masks, pos=None, vm=None,
                 input_ids2=None, masks2=None, pos2=None, vm2=None,
                 constant=None, visualize=False):
    xe1, ab1 = embed_and_bias(params, input_ids, masks, pos, vm)

    if input_ids2 is None:
        x_flat = xe1.reshape(B * S, H)
        bias_flat = build_flat_bias(ab1)
        pool_mat = build_pool_matrix(B, POOLING)
        out = run_dann(x_flat, bias_flat, pool_mat, params, POOLING)
        class_preds = out[:, 0:LABELS]
        # TODO(synk): visualize=True path also returns pooled features; omitted.
        return class_preds

    xe2, ab2 = embed_and_bias(params, input_ids2, masks2, pos2, vm2)
    # fold labeled + unlabeled groups into the matmul M dimension
    x_flat = jnp.concatenate([xe1, xe2], axis=0).reshape(2 * B * S, H)
    bias_flat = build_flat_bias(jnp.concatenate([ab1, ab2], axis=0))   # (2B*S, 2B*S)
    pool_mat = build_pool_matrix(2 * B, POOLING)
    out = run_dann(x_flat, bias_flat, pool_mat, params, POOLING)

    class_preds = out[0:B, 0:LABELS]
    # GradReverse.forward is identity; dc sees features unchanged.
    labeled_preds = out[0:B, LABELS:LABELS + 2]
    unlabeled_preds = out[B:2 * B, LABELS:LABELS + 2]
    return class_preds, labeled_preds, unlabeled_preds


# --------------------------------- main ----------------------------------------
if __name__ == "__main__":
    key = jax.random.PRNGKey(0)
    k_param, k_tok1, k_tok2, k_vm = jax.random.split(key, 4)
    params = init_params(k_param)

    input_ids = jax.random.randint(k_tok1, (B, S), 0, VOCAB, dtype=jnp.int32)
    input_ids2 = jax.random.randint(k_tok2, (B, S), 0, VOCAB, dtype=jnp.int32)
    masks = jnp.ones((B, S), dtype=jnp.float32)
    masks2 = jnp.ones((B, S), dtype=jnp.float32)
    pos = jnp.broadcast_to(jnp.arange(S, dtype=jnp.int32), (B, S))
    # synthetic K-BERT visible matrix (0/1, diagonal visible)
    vm = (jax.random.uniform(k_vm, (B, S, S)) > 0.3).astype(jnp.float32)
    vm = jnp.maximum(vm, jnp.eye(S, dtype=jnp.float32)[None])
    vm2 = jnp.ones((B, S, S), dtype=jnp.float32)
    constant = 0.5

    # full DANN path (labeled + unlabeled) — single fused pallas_call, grid=(1,)
    class_preds, labeled_preds, unlabeled_preds = dann_forward(
        params, input_ids, masks, pos, vm,
        input_ids2, masks2, pos, vm2, constant)
    # classification-only path (input_ids2=None) — same kernel, smaller M
    class_only = dann_forward(params, input_ids, masks, pos, vm)

    jax.block_until_ready((class_preds, labeled_preds, unlabeled_preds, class_only))
    assert class_preds.shape == (B, LABELS)
    assert labeled_preds.shape == (B, 2)
    assert unlabeled_preds.shape == (B, 2)
    assert class_only.shape == (B, LABELS)
    print("KERNEL_OK")
</pallas_src>

<mosaic_0001>
module attributes {stable_mosaic.version = 11 : i64} {
  func.func @dann_kernel(%arg0: i32, %arg1: memref<32x32xf32, #tpu.memory_space<vmem>>, %arg2: memref<32x32xf32, #tpu.memory_space<vmem>>, %arg3: memref<4x32xf32, #tpu.memory_space<vmem>>, %arg4: memref<32x128xf32, #tpu.memory_space<vmem>>, %arg5: memref<32x32xf32, #tpu.memory_space<vmem>>, %arg6: memref<32x128xf32, #tpu.memory_space<vmem>>, %arg7: memref<128x32xf32, #tpu.memory_space<vmem>>, %arg8: memref<32x128xf32, #tpu.memory_space<vmem>>, %arg9: memref<128x128xf32, #tpu.memory_space<vmem>>, %arg10: memref<8x32xf32, #tpu.memory_space<vmem>>, %arg11: memref<4x128xf32, #tpu.memory_space<vmem>>, %arg12: memref<4x128xf32, #tpu.memory_space<vmem>>) attributes {dimension_semantics = [#tpu.dimension_semantics<arbitrary>], iteration_bounds = array<i64: 1>, scalar_prefetch = 0 : i64, scratch_operands = 0 : i64, tpu.core_type = #tpu.core_type<tc>, window_params = [{pipeline_mode = #tpu.pipeline_mode<synchronous>, transform_indices = @transform_0, window_bounds = array<i64: 32, 32>}, {pipeline_mode = #tpu.pipeline_mode<synchronous>, transform_indices = @transform_1, window_bounds = array<i64: 32, 32>}, {pipeline_mode = #tpu.pipeline_mode<synchronous>, transform_indices = @transform_2, window_bounds = array<i64: 4, 32>}, {pipeline_mode = #tpu.pipeline_mode<synchronous>, transform_indices = @transform_3, window_bounds = array<i64: 32, 128>}, {pipeline_mode = #tpu.pipeline_mode<synchronous>, transform_indices = @transform_4, window_bounds = array<i64: 32, 32>}, {pipeline_mode = #tpu.pipeline_mode<synchronous>, transform_indices = @transform_5, window_bounds = array<i64: 32, 128>}, {pipeline_mode = #tpu.pipeline_mode<synchronous>, transform_indices = @transform_6, window_bounds = array<i64: 128, 32>}, {pipeline_mode = #tpu.pipeline_mode<synchronous>, transform_indices = @transform_7, window_bounds = array<i64: 32, 128>}, {pipeline_mode = #tpu.pipeline_mode<synchronous>, transform_indices = @transform_8, window_bounds = array<i64: 128, 128>}, {pipeline_mode = #tpu.pipeline_mode<synchronous>, transform_indices = @transform_9, window_bounds = array<i64: 8, 32>}, {pipeline_mode = #tpu.pipeline_mode<synchronous>, transform_indices = @transform_10, window_bounds = array<i64: 4, 128>}, {pipeline_mode = #tpu.pipeline_mode<synchronous>, transform_indices = @transform_11, window_bounds = array<i64: 4, 128>}]} {
    %c0 = arith.constant 0 : index
    %c0_0 = arith.constant 0 : index
    %0 = vector.load %arg1[%c0, %c0_0] : memref<32x32xf32, #tpu.memory_space<vmem>>, vector<32x32xf32>
    %c0_1 = arith.constant 0 : index
    %c0_2 = arith.constant 0 : index
    %1 = vector.load %arg2[%c0_1, %c0_2] : memref<32x32xf32, #tpu.memory_space<vmem>>, vector<32x32xf32>
    %c0_3 = arith.constant 0 : index
    %c0_4 = arith.constant 0 : index
    %2 = vector.load %arg10[%c0_3, %c0_4] : memref<8x32xf32, #tpu.memory_space<vmem>>, vector<1x32xf32>
    %3 = vector.shape_cast %2 : vector<1x32xf32> to vector<32xf32>
    %c1 = arith.constant 1 : index
    %c0_5 = arith.constant 0 : index
    %4 = vector.load %arg10[%c1, %c0_5] : memref<8x32xf32, #tpu.memory_space<vmem>>, vector<1x32xf32>
    %5 = vector.shape_cast %4 : vector<1x32xf32> to vector<32xf32>
    %cst = arith.constant dense<0.000000e+00> : vector<32xf32>
    %6 = vector.multi_reduction <add>, %0, %cst [1] : vector<32x32xf32> to vector<32xf32>
    %7 = vector.shape_cast %6 : vector<32xf32> to vector<32x1xf32>
    %cst_6 = arith.constant 3.200000e+01 : f32
    %8 = vector.broadcast %cst_6 : f32 to vector<32x1xf32>
    %9 = arith.divf %7, %8 : vector<32x1xf32>
    %10 = vector.broadcast %9 : vector<32x1xf32> to vector<32x32xf32>
    %11 = arith.subf %0, %10 : vector<32x32xf32>
    %12 = arith.mulf %11, %11 : vector<32x32xf32>
    %cst_7 = arith.constant dense<0.000000e+00> : vector<32xf32>
    %13 = vector.multi_reduction <add>, %12, %cst_7 [1] : vector<32x32xf32> to vector<32xf32>
    %14 = vector.shape_cast %13 : vector<32xf32> to vector<32x1xf32>
    %cst_8 = arith.constant 3.200000e+01 : f32
    %15 = vector.broadcast %cst_8 : f32 to vector<32x1xf32>
    %16 = arith.divf %14, %15 : vector<32x1xf32>
    %17 = vector.broadcast %9 : vector<32x1xf32> to vector<32x32xf32>
    %18 = arith.subf %0, %17 : vector<32x32xf32>
    %cst_9 = arith.constant 9.99999996E-13 : f32
    %19 = vector.broadcast %cst_9 : f32 to vector<32x1xf32>
    %20 = arith.addf %16, %19 : vector<32x1xf32>
    %21 = math.rsqrt %20 : vector<32x1xf32>
    %22 = vector.broadcast %21 : vector<32x1xf32> to vector<32x32xf32>
    %23 = arith.mulf %18, %22 : vector<32x32xf32>
    %24 = vector.shape_cast %3 : vector<32xf32> to vector<1x32xf32>
    %25 = vector.broadcast %24 : vector<1x32xf32> to vector<32x32xf32>
    %26 = arith.mulf %23, %25 : vector<32x32xf32>
    %27 = vector.shape_cast %5 : vector<32xf32> to vector<1x32xf32>
    %28 = vector.broadcast %27 : vector<1x32xf32> to vector<32x32xf32>
    %29 = arith.addf %26, %28 : vector<32x32xf32>
    %c0_10 = arith.constant 0 : index
    %c0_11 = arith.constant 0 : index
    %30 = vector.load %arg4[%c0_10, %c0_11] : memref<32x128xf32, #tpu.memory_space<vmem>>, vector<32x128xf32>
    %cst_12 = arith.constant dense<0.000000e+00> : vector<32x128xf32>
    %31 = tpu.matmul %29, %30, %cst_12 {dimension_numbers = #tpu.dot_dimension_numbers<[1], [0], [0], [1], [0, 0, 1, 1], [], []>} : vector<32x32xf32>, vector<32x128xf32>, vector<32x128xf32> -> vector<32x128xf32>
    %c0_13 = arith.constant 0 : index
    %c0_14 = arith.constant 0 : index
    %32 = vector.load %arg11[%c0_13, %c0_14] : memref<4x128xf32, #tpu.memory_space<vmem>>, vector<1x128xf32>
    %33 = vector.shape_cast %32 : vector<1x128xf32> to vector<128xf32>
    %34 = vector.shape_cast %33 : vector<128xf32> to vector<1x128xf32>
    %35 = vector.broadcast %34 : vector<1x128xf32> to vector<32x128xf32>
    %36 = arith.addf %31, %35 : vector<32x128xf32>
    %37 = vector.extract_strided_slice %36 {offsets = [0, 0], sizes = [32, 16], strides = [1, 1]} : vector<32x128xf32> to vector<32x16xf32>
    %38 = vector.extract_strided_slice %36 {offsets = [0, 32], sizes = [32, 16], strides = [1, 1]} : vector<32x128xf32> to vector<32x16xf32>
    %39 = vector.extract_strided_slice %36 {offsets = [0, 64], sizes = [32, 16], strides = [1, 1]} : vector<32x128xf32> to vector<32x16xf32>
    "tpu.trace_start"() <{level = 10 : i32, message = "md,nd->mn"}> : () -> ()
    %cst_15 = arith.constant dense<0.000000e+00> : vector<32x32xf32>
    %40 = tpu.matmul %37, %38, %cst_15 {dimension_numbers = #tpu.dot_dimension_numbers<[1], [1], [0], [0], [0, 0, 1, 0], [], []>} : vector<32x16xf32>, vector<32x16xf32>, vector<32x32xf32> -> vector<32x32xf32>
    "tpu.trace_stop"() : () -> ()
    %cst_16 = arith.constant 2.500000e-01 : f32
    %41 = vector.broadcast %cst_16 : f32 to vector<32x32xf32>
    %42 = arith.mulf %40, %41 : vector<32x32xf32>
    %43 = arith.addf %42, %1 : vector<32x32xf32>
    %cst_17 = arith.constant dense<0xFF800000> : vector<32xf32>
    %44 = vector.multi_reduction <maximumf>, %43, %cst_17 [1] : vector<32x32xf32> to vector<32xf32>
    %45 = vector.shape_cast %44 : vector<32xf32> to vector<32x1xf32>
    %46 = vector.broadcast %45 : vector<32x1xf32> to vector<32x32xf32>
    %47 = arith.subf %43, %46 : vector<32x32xf32>
    %48 = math.exp %47 : vector<32x32xf32>
    %cst_18 = arith.constant dense<0.000000e+00> : vector<32xf32>
    %49 = vector.multi_reduction <add>, %48, %cst_18 [1] : vector<32x32xf32> to vector<32xf32>
    %50 = vector.shape_cast %49 : vector<32xf32> to vector<32x1xf32>
    %51 = tpu.reciprocal %50 {approx = true} : vector<32x1xf32> -> vector<32x1xf32>
    %52 = vector.broadcast %51 : vector<32x1xf32> to vector<32x32xf32>
    %53 = arith.mulf %48, %52 : vector<32x32xf32>
    %cst_19 = arith.constant dense<0.000000e+00> : vector<32x16xf32>
    %54 = tpu.matmul %53, %39, %cst_19 {dimension_numbers = #tpu.dot_dimension_numbers<[1], [0], [0], [1], [0, 0, 1, 1], [], []>} : vector<32x32xf32>, vector<32x16xf32>, vector<32x16xf32> -> vector<32x16xf32>
    %55 = vector.extract_strided_slice %36 {offsets = [0, 16], sizes = [32, 16], strides = [1, 1]} : vector<32x128xf32> to vector<32x16xf32>
    %56 = vector.extract_strided_slice %36 {offsets = [0, 48], sizes = [32, 16], strides = [1, 1]} : vector<32x128xf32> to vector<32x16xf32>
    %57 = vector.extract_strided_slice %36 {offsets = [0, 80], sizes = [32, 16], strides = [1, 1]} : vector<32x128xf32> to vector<32x16xf32>
    "tpu.trace_start"() <{level = 10 : i32, message = "md,nd->mn"}> : () -> ()
    %cst_20 = arith.constant dense<0.000000e+00> : vector<32x32xf32>
    %58 = tpu.matmul %55, %56, %cst_20 {dimension_numbers = #tpu.dot_dimension_numbers<[1], [1], [0], [0], [0, 0, 1, 0], [], []>} : vector<32x16xf32>, vector<32x16xf32>, vector<32x32xf32> -> vector<32x32xf32>
    "tpu.trace_stop"() : () -> ()
    %cst_21 = arith.constant 2.500000e-01 : f32
    %59 = vector.broadcast %cst_21 : f32 to vector<32x32xf32>
    %60 = arith.mulf %58, %59 : vector<32x32xf32>
    %61 = arith.addf %60, %1 : vector<32x32xf32>
    %cst_22 = arith.constant dense<0xFF800000> : vector<32xf32>
    %62 = vector.multi_reduction <maximumf>, %61, %cst_22 [1] : vector<32x32xf32> to vector<32xf32>
    %63 = vector.shape_cast %62 : vector<32xf32> to vector<32x1xf32>
    %64 = vector.broadcast %63 : vector<32x1xf32> to vector<32x32xf32>
    %65 = arith.subf %61, %64 : vector<32x32xf32>
    %66 = math.exp %65 : vector<32x32xf32>
    %cst_23 = arith.constant dense<0.000000e+00> : vector<32xf32>
    %67 = vector.multi_reduction <add>, %66, %cst_23 [1] : vector<32x32xf32> to vector<32xf32>
    %68 = vector.shape_cast %67 : vector<32xf32> to vector<32x1xf32>
    %69 = tpu.reciprocal %68 {approx = true} : vector<32x1xf32> -> vector<32x1xf32>
    %70 = vector.broadcast %69 : vector<32x1xf32> to vector<32x32xf32>
    %71 = arith.mulf %66, %70 : vector<32x32xf32>
    %cst_24 = arith.constant dense<0.000000e+00> : vector<32x16xf32>
    %72 = tpu.matmul %71, %57, %cst_24 {dimension_numbers = #tpu.dot_dimension_numbers<[1], [0], [0], [1], [0, 0, 1, 1], [], []>} : vector<32x32xf32>, vector<32x16xf32>, vector<32x16xf32> -> vector<32x16xf32>
    %73 = tpu.concatenate %54, %72 in 1 : vector<32x16xf32>, vector<32x16xf32> -> vector<32x32xf32>
    %c0_25 = arith.constant 0 : index
    %c0_26 = arith.constant 0 : index
    %74 = vector.load %arg5[%c0_25, %c0_26] : memref<32x32xf32, #tpu.memory_space<vmem>>, vector<32x32xf32>
    %cst_27 = arith.constant dense<0.000000e+00> : vector<32x32xf32>
    %75 = tpu.matmul %73, %74, %cst_27 {dimension_numbers = #tpu.dot_dimension_numbers<[1], [0], [0], [1], [0, 0, 1, 1], [], []>} : vector<32x32xf32>, vector<32x32xf32>, vector<32x32xf32> -> vector<32x32xf32>
    %c2 = arith.constant 2 : index
    %c0_28 = arith.constant 0 : index
    %76 = vector.load %arg10[%c2, %c0_28] : memref<8x32xf32, #tpu.memory_space<vmem>>, vector<1x32xf32>
    %77 = vector.shape_cast %76 : vector<1x32xf32> to vector<32xf32>
    %78 = vector.shape_cast %77 : vector<32xf32> to vector<1x32xf32>
    %79 = vector.broadcast %78 : vector<1x32xf32> to vector<32x32xf32>
    %80 = arith.addf %75, %79 : vector<32x32xf32>
    %81 = arith.addf %29, %80 : vector<32x32xf32>
    %c3 = arith.constant 3 : index
    %c0_29 = arith.constant 0 : index
    %82 = vector.load %arg10[%c3, %c0_29] : memref<8x32xf32, #tpu.memory_space<vmem>>, vector<1x32xf32>
    %83 = vector.shape_cast %82 : vector<1x32xf32> to vector<32xf32>
    %c4 = arith.constant 4 : index
    %c0_30 = arith.constant 0 : index
    %84 = vector.load %arg10[%c4, %c0_30] : memref<8x32xf32, #tpu.memory_space<vmem>>, vector<1x32xf32>
    %85 = vector.shape_cast %84 : vector<1x32xf32> to vector<32xf32>
    %cst_31 = arith.constant dense<0.000000e+00> : vector<32xf32>
    %86 = vector.multi_reduction <add>, %81, %cst_31 [1] : vector<32x32xf32> to vector<32xf32>
    %87 = vector.shape_cast %86 : vector<32xf32> to vector<32x1xf32>
    %cst_32 = arith.constant 3.200000e+01 : f32
    %88 = vector.broadcast %cst_32 : f32 to vector<32x1xf32>
    %89 = arith.divf %87, %88 : vector<32x1xf32>
    %90 = vector.broadcast %89 : vector<32x1xf32> to vector<32x32xf32>
    %91 = arith.subf %81, %90 : vector<32x32xf32>
    %92 = arith.mulf %91, %91 : vector<32x32xf32>
    %cst_33 = arith.constant dense<0.000000e+00> : vector<32xf32>
    %93 = vector.multi_reduction <add>, %92, %cst_33 [1] : vector<32x32xf32> to vector<32xf32>
    %94 = vector.shape_cast %93 : vector<32xf32> to vector<32x1xf32>
    %cst_34 = arith.constant 3.200000e+01 : f32
    %95 = vector.broadcast %cst_34 : f32 to vector<32x1xf32>
    %96 = arith.divf %94, %95 : vector<32x1xf32>
    %97 = vector.broadcast %89 : vector<32x1xf32> to vector<32x32xf32>
    %98 = arith.subf %81, %97 : vector<32x32xf32>
    %cst_35 = arith.constant 9.99999996E-13 : f32
    %99 = vector.broadcast %cst_35 : f32 to vector<32x1xf32>
    %100 = arith.addf %96, %99 : vector<32x1xf32>
    %101 = math.rsqrt %100 : vector<32x1xf32>
    %102 = vector.broadcast %101 : vector<32x1xf32> to vector<32x32xf32>
    %103 = arith.mulf %98, %102 : vector<32x32xf32>
    %104 = vector.shape_cast %83 : vector<32xf32> to vector<1x32xf32>
    %105 = vector.broadcast %104 : vector<1x32xf32> to vector<32x32xf32>
    %106 = arith.mulf %103, %105 : vector<32x32xf32>
    %107 = vector.shape_cast %85 : vector<32xf32> to vector<1x32xf32>
    %108 = vector.broadcast %107 : vector<1x32xf32> to vector<32x32xf32>
    %109 = arith.addf %106, %108 : vector<32x32xf32>
    %c0_36 = arith.constant 0 : index
    %c0_37 = arith.constant 0 : index
    %110 = vector.load %arg6[%c0_36, %c0_37] : memref<32x128xf32, #tpu.memory_space<vmem>>, vector<32x128xf32>
    %cst_38 = arith.constant dense<0.000000e+00> : vector<32x128xf32>
    %111 = tpu.matmul %109, %110, %cst_38 {dimension_numbers = #tpu.dot_dimension_numbers<[1], [0], [0], [1], [0, 0, 1, 1], [], []>} : vector<32x32xf32>, vector<32x128xf32>, vector<32x128xf32> -> vector<32x128xf32>
    %c1_39 = arith.constant 1 : index
    %c0_40 = arith.constant 0 : index
    %112 = vector.load %arg11[%c1_39, %c0_40] : memref<4x128xf32, #tpu.memory_space<vmem>>, vector<1x128xf32>
    %113 = vector.shape_cast %112 : vector<1x128xf32> to vector<128xf32>
    %114 = vector.shape_cast %113 : vector<128xf32> to vector<1x128xf32>
    %115 = vector.broadcast %114 : vector<1x128xf32> to vector<32x128xf32>
    %116 = arith.addf %111, %115 : vector<32x128xf32>
    %cst_41 = arith.constant 5.000000e-01 : f32
    %117 = vector.broadcast %cst_41 : f32 to vector<32x128xf32>
    %118 = arith.mulf %117, %116 : vector<32x128xf32>
    %cst_42 = arith.constant 4.471500e-02 : f32
    %119 = vector.broadcast %cst_42 : f32 to vector<32x128xf32>
    %120 = arith.mulf %119, %116 : vector<32x128xf32>
    %121 = arith.mulf %120, %116 : vector<32x128xf32>
    %122 = arith.mulf %121, %116 : vector<32x128xf32>
    %123 = arith.addf %116, %122 : vector<32x128xf32>
    %cst_43 = arith.constant 0.797884583 : f32
    %124 = vector.broadcast %cst_43 : f32 to vector<32x128xf32>
    %125 = arith.mulf %124, %123 : vector<32x128xf32>
    %126 = math.tanh %125 : vector<32x128xf32>
    %cst_44 = arith.constant 1.000000e+00 : f32
    %127 = vector.broadcast %cst_44 : f32 to vector<32x128xf32>
    %128 = arith.addf %127, %126 : vector<32x128xf32>
    %129 = arith.mulf %118, %128 : vector<32x128xf32>
    %c0_45 = arith.constant 0 : index
    %c0_46 = arith.constant 0 : index
    %130 = vector.load %arg7[%c0_45, %c0_46] : memref<128x32xf32, #tpu.memory_space<vmem>>, vector<128x32xf32>
    %cst_47 = arith.constant dense<0.000000e+00> : vector<32x32xf32>
    %131 = tpu.matmul %129, %130, %cst_47 {dimension_numbers = #tpu.dot_dimension_numbers<[1], [0], [0], [1], [0, 0, 1, 1], [], []>} : vector<32x128xf32>, vector<128x32xf32>, vector<32x32xf32> -> vector<32x32xf32>
    %c5 = arith.constant 5 : index
    %c0_48 = arith.constant 0 : index
    %132 = vector.load %arg10[%c5, %c0_48] : memref<8x32xf32, #tpu.memory_space<vmem>>, vector<1x32xf32>
    %133 = vector.shape_cast %132 : vector<1x32xf32> to vector<32xf32>
    %134 = vector.shape_cast %133 : vector<32xf32> to vector<1x32xf32>
    %135 = vector.broadcast %134 : vector<1x32xf32> to vector<32x32xf32>
    %136 = arith.addf %131, %135 : vector<32x32xf32>
    %137 = arith.addf %109, %136 : vector<32x32xf32>
    %c6 = arith.constant 6 : index
    %c0_49 = arith.constant 0 : index
    %138 = vector.load %arg10[%c6, %c0_49] : memref<8x32xf32, #tpu.memory_space<vmem>>, vector<1x32xf32>
    %139 = vector.shape_cast %138 : vector<1x32xf32> to vector<32xf32>
    %c7 = arith.constant 7 : index
    %c0_50 = arith.constant 0 : index
    %140 = vector.load %arg10[%c7, %c0_50] : memref<8x32xf32, #tpu.memory_space<vmem>>, vector<1x32xf32>
    %141 = vector.shape_cast %140 : vector<1x32xf32> to vector<32xf32>
    %cst_51 = arith.constant dense<0.000000e+00> : vector<32xf32>
    %142 = vector.multi_reduction <add>, %137, %cst_51 [1] : vector<32x32xf32> to vector<32xf32>
    %143 = vector.shape_cast %142 : vector<32xf32> to vector<32x1xf32>
    %cst_52 = arith.constant 3.200000e+01 : f32
    %144 = vector.broadcast %cst_52 : f32 to vector<32x1xf32>
    %145 = arith.divf %143, %144 : vector<32x1xf32>
    %146 = vector.broadcast %145 : vector<32x1xf32> to vector<32x32xf32>
    %147 = arith.subf %137, %146 : vector<32x32xf32>
    %148 = arith.mulf %147, %147 : vector<32x32xf32>
    %cst_53 = arith.constant dense<0.000000e+00> : vector<32xf32>
    %149 = vector.multi_reduction <add>, %148, %cst_53 [1] : vector<32x32xf32> to vector<32xf32>
    %150 = vector.shape_cast %149 : vector<32xf32> to vector<32x1xf32>
    %cst_54 = arith.constant 3.200000e+01 : f32
    %151 = vector.broadcast %cst_54 : f32 to vector<32x1xf32>
    %152 = arith.divf %150, %151 : vector<32x1xf32>
    %153 = vector.broadcast %145 : vector<32x1xf32> to vector<32x32xf32>
    %154 = arith.subf %137, %153 : vector<32x32xf32>
    %cst_55 = arith.constant 9.99999996E-13 : f32
    %155 = vector.broadcast %cst_55 : f32 to vector<32x1xf32>
    %156 = arith.addf %152, %155 : vector<32x1xf32>
    %157 = math.rsqrt %156 : vector<32x1xf32>
    %158 = vector.broadcast %157 : vector<32x1xf32> to vector<32x32xf32>
    %159 = arith.mulf %154, %158 : vector<32x32xf32>
    %160 = vector.shape_cast %139 : vector<32xf32> to vector<1x32xf32>
    %161 = vector.broadcast %160 : vector<1x32xf32> to vector<32x32xf32>
    %162 = arith.mulf %159, %161 : vector<32x32xf32>
    %163 = vector.shape_cast %141 : vector<32xf32> to vector<1x32xf32>
    %164 = vector.broadcast %163 : vector<1x32xf32> to vector<32x32xf32>
    %165 = arith.addf %162, %164 : vector<32x32xf32>
    %c0_56 = arith.constant 0 : index
    %c0_57 = arith.constant 0 : index
    %166 = vector.load %arg3[%c0_56, %c0_57] : memref<4x32xf32, #tpu.memory_space<vmem>>, vector<4x32xf32>
    %cst_58 = arith.constant dense<0.000000e+00> : vector<4x32xf32>
    %167 = tpu.matmul %166, %165, %cst_58 {dimension_numbers = #tpu.dot_dimension_numbers<[1], [0], [0], [1], [0, 0, 1, 1], [], []>} : vector<4x32xf32>, vector<32x32xf32>, vector<4x32xf32> -> vector<4x32xf32>
    %c0_59 = arith.constant 0 : index
    %c0_60 = arith.constant 0 : index
    %168 = vector.load %arg8[%c0_59, %c0_60] : memref<32x128xf32, #tpu.memory_space<vmem>>, vector<32x128xf32>
    %cst_61 = arith.constant dense<0.000000e+00> : vector<4x128xf32>
    %169 = tpu.matmul %167, %168, %cst_61 {dimension_numbers = #tpu.dot_dimension_numbers<[1], [0], [0], [1], [0, 0, 1, 1], [], []>} : vector<4x32xf32>, vector<32x128xf32>, vector<4x128xf32> -> vector<4x128xf32>
    %c2_62 = arith.constant 2 : index
    %c0_63 = arith.constant 0 : index
    %170 = vector.load %arg11[%c2_62, %c0_63] : memref<4x128xf32, #tpu.memory_space<vmem>>, vector<1x128xf32>
    %171 = vector.shape_cast %170 : vector<1x128xf32> to vector<128xf32>
    %172 = vector.shape_cast %171 : vector<128xf32> to vector<1x128xf32>
    %173 = vector.broadcast %172 : vector<1x128xf32> to vector<4x128xf32>
    %174 = arith.addf %169, %173 : vector<4x128xf32>
    %cst_64 = arith.constant 0.000000e+00 : f32
    %175 = vector.broadcast %cst_64 : f32 to vector<4x128xf32>
    %176 = arith.maximumf %174, %175 : vector<4x128xf32>
    %c0_65 = arith.constant 0 : index
    %c0_66 = arith.constant 0 : index
    %177 = vector.load %arg9[%c0_65, %c0_66] : memref<128x128xf32, #tpu.memory_space<vmem>>, vector<128x128xf32>
    %cst_67 = arith.constant dense<0.000000e+00> : vector<4x128xf32>
    %178 = tpu.matmul %176, %177, %cst_67 {dimension_numbers = #tpu.dot_dimension_numbers<[1], [0], [0], [1], [0, 0, 1, 1], [], []>} : vector<4x128xf32>, vector<128x128xf32>, vector<4x128xf32> -> vector<4x128xf32>
    %c3_68 = arith.constant 3 : index
    %c0_69 = arith.constant 0 : index
    %179 = vector.load %arg11[%c3_68, %c0_69] : memref<4x128xf32, #tpu.memory_space<vmem>>, vector<1x128xf32>
    %180 = vector.shape_cast %179 : vector<1x128xf32> to vector<128xf32>
    %181 = vector.shape_cast %180 : vector<128xf32> to vector<1x128xf32>
    %182 = vector.broadcast %181 : vector<1x128xf32> to vector<4x128xf32>
    %183 = arith.addf %178, %182 : vector<4x128xf32>
    %c0_70 = arith.constant 0 : index
    %c0_71 = arith.constant 0 : index
    %184 = vector.load %arg12[%c0_70, %c0_71] : memref<4x128xf32, #tpu.memory_space<vmem>>, vector<4x128xf32>
    tpu.vector_store %arg12[%c0_70, %c0_71], %183 {strides = array<i32>} : memref<4x128xf32, #tpu.memory_space<vmem>>, vector<4x128xf32>,
    return
  }
  func.func @transform_0(%arg0: i32) -> (i32, i32) {
    %c0_i32 = arith.constant 0 : i32
    %c0_i32_0 = arith.constant 0 : i32
    %c0_i32_1 = arith.constant 0 : i32
    return %c0_i32, %c0_i32_0 : i32, i32
  }
  func.func @transform_1(%arg0: i32) -> (i32, i32) {
    %c0_i32 = arith.constant 0 : i32
    %c0_i32_0 = arith.constant 0 : i32
    %c0_i32_1 = arith.constant 0 : i32
    return %c0_i32, %c0_i32_0 : i32, i32
  }
  func.func @transform_2(%arg0: i32) -> (i32, i32) {
    %c0_i32 = arith.constant 0 : i32
    %c0_i32_0 = arith.constant 0 : i32
    %c0_i32_1 = arith.constant 0 : i32
    return %c0_i32, %c0_i32_0 : i32, i32
  }
  func.func @transform_3(%arg0: i32) -> (i32, i32) {
    %c0_i32 = arith.constant 0 : i32
    %c0_i32_0 = arith.constant 0 : i32
    %c0_i32_1 = arith.constant 0 : i32
    return %c0_i32, %c0_i32_0 : i32, i32
  }
  func.func @transform_4(%arg0: i32) -> (i32, i32) {
    %c0_i32 = arith.constant 0 : i32
    %c0_i32_0 = arith.constant 0 : i32
    %c0_i32_1 = arith.constant 0 : i32
    return %c0_i32, %c0_i32_0 : i32, i32
  }
  func.func @transform_5(%arg0: i32) -> (i32, i32) {
    %c0_i32 = arith.constant 0 : i32
    %c0_i32_0 = arith.constant 0 : i32
    %c0_i32_1 = arith.constant 0 : i32
    return %c0_i32, %c0_i32_0 : i32, i32
  }
  func.func @transform_6(%arg0: i32) -> (i32, i32) {
    %c0_i32 = arith.constant 0 : i32
    %c0_i32_0 = arith.constant 0 : i32
    %c0_i32_1 = arith.constant 0 : i32
    return %c0_i32, %c0_i32_0 : i32, i32
  }
  func.func @transform_7(%arg0: i32) -> (i32, i32) {
    %c0_i32 = arith.constant 0 : i32
    %c0_i32_0 = arith.constant 0 : i32
    %c0_i32_1 = arith.constant 0 : i32
    return %c0_i32, %c0_i32_0 : i32, i32
  }
  func.func @transform_8(%arg0: i32) -> (i32, i32) {
    %c0_i32 = arith.constant 0 : i32
    %c0_i32_0 = arith.constant 0 : i32
    %c0_i32_1 = arith.constant 0 : i32
    return %c0_i32, %c0_i32_0 : i32, i32
  }
  func.func @transform_9(%arg0: i32) -> (i32, i32) {
    %c0_i32 = arith.constant 0 : i32
    %c0_i32_0 = arith.constant 0 : i32
    %c0_i32_1 = arith.constant 0 : i32
    return %c0_i32, %c0_i32_0 : i32, i32
  }
  func.func @transform_10(%arg0: i32) -> (i32, i32) {
    %c0_i32 = arith.constant 0 : i32
    %c0_i32_0 = arith.constant 0 : i32
    %c0_i32_1 = arith.constant 0 : i32
    return %c0_i32, %c0_i32_0 : i32, i32
  }
  func.func @transform_11(%arg0: i32) -> (i32, i32) {
    %c0_i32 = arith.constant 0 : i32
    %c0_i32_0 = arith.constant 0 : i32
    %c0_i32_1 = arith.constant 0 : i32
    return %c0_i32, %c0_i32_0 : i32, i32
  }
}

</mosaic_0001>

<bundles_post_ra>
// kernel: tpu_custom_call.1
= control target key start
LH: loop header
LB: loop body
LE: loop exit
PB: predicated region body
PF: predicated region fallthrough
CT: control target
= control target key end

     0   :  { %16 = vsyncpa [#allocation3], 0  ;;  %s2904_s0 = inlined_call_operand.vmem [shape: f32[32,32], index: 0, kind: input, shape index: {}]   ;;  %s2905_s1 = inlined_call_operand.hbm [shape: f32[32,32], index: 1, kind: input, shape index: {}]   ;;  %s2906_s2 = inlined_call_operand.vmem [shape: f32[4,32], index: 2, kind: input, shape index: {}]   ;;  %s2907_s3 = inlined_call_operand.hbm [shape: f32[32,128], index: 3, kind: input, shape index: {}]   ;;  %s2908_s4 = inlined_call_operand.hbm [shape: f32[32,32], index: 4, kind: input, shape index: {}]   ;;  %s2909_s5 = inlined_call_operand.hbm [shape: f32[32,128], index: 5, kind: input, shape index: {}]   ;;  %s2910_s6 = inlined_call_operand.vmem [shape: f32[128,32], index: 6, kind: input, shape index: {}]   ;;  %s2911_s7 = inlined_call_operand.hbm [shape: f32[32,128], index: 7, kind: input, shape index: {}]   ;;  %s2912_s8 = inlined_call_operand.vmem [shape: f32[128,128], index: 8, kind: input, shape index: {}]   ;;  %s2913_s9 = inlined_call_operand.vmem [shape: f32[8,32], index: 9, kind: input, shape index: {}]   ;;  %s2914_s10 = inlined_call_operand.vmem [shape: f32[4,128], index: 10, kind: input, shape index: {}]   ;;  %s2915_s11 = inlined_call_operand.hbm [shape: f32[4,128], index: 11, kind: output, shape index: {}]  }
   0x1   :  { %17 = vsyncpa [#allocation6], 0 }
   0x2   :  { %18 = vsyncpa [#allocation9], 0 }
   0x3   :  { %19 = vsyncpa [#allocation4], 0  ;;  %s2373_s17 = smov [#allocation5]   ;;  %s2374_s19 = smov [#allocation8]  }
   0x4   :  { %s41_s18 = sshll.u32 %s2373_s17, 4  ;;  %s65_s20 = sshll.u32 %s2374_s19, 4  ;;  %s42_s18 = int_to_ptr.vmem [resolvable:$true] %s41_s18  ;;  %s2450_s20 = int_to_ptr.vmem [resolvable:$true] %s65_s20 }
   0x5   :  { %s2233_s23 = scalar_lea.hbm %s2907_s3, 512 }
   0x6   :  { %p2234_p0 = scmp.ne.s32.totalorder %s2907_s3, %s2233_s23  ;;  %p2237_p1 = scmp.lt.u32.totalorder %s2233_s23, %s2907_s3 }
   0x8   :  { %p2239_p2 = pnand %p2237_p1, %p2234_p0 }
   0xa   :  { %2242 = shalt.err (!%p2239_p2)
}
   0xb   :  { %s2243_s28 = scalar_lea.vmem %s42_s18, 512  ;;  %p2248_p4 = scmp.lt.s32.totalorder %s42_s18, %s42_s18 }
   0xc   :  { %p2244_p3 = scmp.ne.s32.totalorder %s42_s18, %s2243_s28  ;;  %p2249_p5 = scmp.lt.s32.totalorder %s2243_s28, %s2243_s28 }
   0xe   :  { %p2250_p6 = por %p2249_p5, %p2248_p4 }
  0x10   :  { %p2251_p7 = pnand %p2250_p6, %p2244_p3 }
  0x12   :  { %2254 = shalt.err (!%p2251_p7)
}
  0x13   :  { %s2375_s29 = smov 128   ;;  %s2376_s30 = smov 8  }
  0x14   :  { %47 = dma.hbm_to_vmem [thread:$0]  %s2907_s3, 512, %s42_s18, [#allocation6], %s2375_s29, %s2375_s29, %s2376_s30  }
  0x15   :  { %s2255_s16 = scalar_lea.hbm %s2909_s5, 512 }
  0x16   :  { %p2256_p8 = scmp.ne.s32.totalorder %s2909_s5, %s2255_s16  ;;  %p2259_p9 = scmp.lt.u32.totalorder %s2255_s16, %s2909_s5 }
  0x18   :  { %p2261_p10 = pnand %p2259_p9, %p2256_p8 }
  0x1a   :  { %2264 = shalt.err (!%p2261_p10)
}
  0x1b   :  { %s2265_s23 = scalar_lea.vmem %s2450_s20, 512  ;;  %p2270_p12 = scmp.lt.s32.totalorder %s2450_s20, %s2450_s20 }
  0x1c   :  { %p2266_p11 = scmp.ne.s32.totalorder %s2450_s20, %s2265_s23  ;;  %p2271_p13 = scmp.lt.s32.totalorder %s2265_s23, %s2265_s23 }
  0x1e   :  { %p2272_p0 = por %p2271_p13, %p2270_p12 }
  0x20   :  { %p2273_p1 = pnand %p2272_p0, %p2266_p11 }
  0x22   :  { %2276 = shalt.err (!%p2273_p1)
}
  0x23   :  { %71 = dma.hbm_to_vmem [thread:$0]  %s2909_s5, 512, %s2450_s20, [#allocation9], %s2375_s29, %s2375_s29, %s2376_s30  }
  0x24   :  { %s2377_s24 = smov [#allocation2]   ;;  %s2378_s26 = smov [#allocation7]  }
  0x25   :  { %s27_s25 = sshll.u32 %s2377_s24, 4  ;;  %s53_s27 = sshll.u32 %s2378_s26, 4  ;;  %s28_s25 = int_to_ptr.vmem [resolvable:$true] %s27_s25  ;;  %s2487_s27 = int_to_ptr.vmem [resolvable:$true] %s53_s27 }
  0x26   :  { %s2277_s13 = scalar_lea.hbm %s2905_s1, 512 }
  0x27   :  { %p2278_p2 = scmp.ne.s32.totalorder %s2905_s1, %s2277_s13  ;;  %p2281_p3 = scmp.lt.u32.totalorder %s2277_s13, %s2905_s1 }
  0x29   :  { %p2283_p4 = pnand %p2281_p3, %p2278_p2 }
  0x2b   :  { %2286 = shalt.err (!%p2283_p4)
}
  0x2c   :  { %s2287_s5 = scalar_lea.vmem %s28_s25, 512  ;;  %p2292_p6 = scmp.lt.s32.totalorder %s28_s25, %s28_s25 }
  0x2d   :  { %p2288_p5 = scmp.ne.s32.totalorder %s28_s25, %s2287_s5  ;;  %p2293_p7 = scmp.lt.s32.totalorder %s2287_s5, %s2287_s5 }
  0x2f   :  { %p2294_p8 = por %p2293_p7, %p2292_p6 }
  0x31   :  { %p2295_p9 = pnand %p2294_p8, %p2288_p5 }
  0x33   :  { %2298 = shalt.err (!%p2295_p9)
}
  0x34   :  { %33 = dma.hbm_to_vmem [thread:$0]  %s2905_s1, 512, %s28_s25, [#allocation3], %s2375_s29, %s2375_s29, %s2376_s30  }
  0x35   :  { %s2299_s23 = scalar_lea.hbm %s2908_s4, 512 }
  0x36   :  { %p2300_p10 = scmp.ne.s32.totalorder %s2908_s4, %s2299_s23  ;;  %p2303_p11 = scmp.lt.u32.totalorder %s2299_s23, %s2908_s4 }
  0x38   :  { %p2305_p12 = pnand %p2303_p11, %p2300_p10 }
  0x3a   :  { %2308 = shalt.err (!%p2305_p12)
}
  0x3b   :  { %s2309_s28 = scalar_lea.vmem %s2487_s27, 512  ;;  %p2314_p0 = scmp.lt.s32.totalorder %s2487_s27, %s2487_s27 }
  0x3c   :  { %p2310_p13 = scmp.ne.s32.totalorder %s2487_s27, %s2309_s28  ;;  %p2315_p1 = scmp.lt.s32.totalorder %s2309_s28, %s2309_s28 }
  0x3e   :  { %p2316_p2 = por %p2315_p1, %p2314_p0 }
  0x40   :  { %p2317_p3 = pnand %p2316_p2, %p2310_p13 }
  0x42   :  { %2320 = shalt.err (!%p2317_p3)
}
  0x43   :  { %59 = dma.hbm_to_vmem [thread:$0]  %s2908_s4, 512, %s2487_s27, [#allocation6], %s2375_s29, %s2375_s29, %s2376_s30  }
  0x44   :  { %s2379_s12 = smov [#allocation10]   ;;  %s2321_s16 = scalar_lea.hbm %s2911_s7, 512 }
  0x45   :  { %s79_s13 = sshll.u32 %s2379_s12, 4  ;;  %p2322_p4 = scmp.ne.s32.totalorder %s2911_s7, %s2321_s16  ;;  %s80_s13 = int_to_ptr.vmem [resolvable:$true] %s79_s13 }
  0x46   :  { %p2325_p5 = scmp.lt.u32.totalorder %s2321_s16, %s2911_s7 }
  0x48   :  { %p2327_p6 = pnand %p2325_p5, %p2322_p4 }
  0x4a   :  { %2330 = shalt.err (!%p2327_p6)
}
  0x4b   :  { %s2331_s21 = scalar_lea.vmem %s80_s13, 512  ;;  %p2336_p8 = scmp.lt.s32.totalorder %s80_s13, %s80_s13 }
  0x4c   :  { %p2332_p7 = scmp.ne.s32.totalorder %s80_s13, %s2331_s21  ;;  %p2337_p9 = scmp.lt.s32.totalorder %s2331_s21, %s2331_s21 }
  0x4e   :  { %p2338_p10 = por %p2337_p9, %p2336_p8 }
  0x50   :  { %p2339_p11 = pnand %p2338_p10, %p2332_p7 }
  0x52   :  { %2342 = shalt.err (!%p2339_p11)
}
  0x53   :  { %85 = dma.hbm_to_vmem [thread:$0]  %s2911_s7, 512, %s80_s13, [#allocation9], %s2375_s29, %s2375_s29, %s2376_s30  }
  0x54   :  { %2365 = dma.done.wait [#allocation3], 512  }
  0x55   :  { %2366 = vsyncadd [#allocation3], 4294966784 }
  0x56   :  { %2367 = dma.done.wait [#allocation6], 1024  }
  0x57   :  { %2368 = vsyncadd [#allocation6], 4294966272 }
  0x58   :  { %2369 = dma.done.wait [#allocation9], 1024  }
  0x59   :  { %2370 = vsyncadd [#allocation9], 4294966272  ;;  %vm117_vm0 = vcmask 261120   ;;  %v107_v0 = vld [vmem:[%s2904_s0] sm:$0xff]  ;;  %v109_v1 = vld [vmem:[%s2904_s0 + $0x10] sm:$0xff]  ;;  %vm305_vm1 = vcmask 130048  }
  0x5a   :  { %v108_v2 = vld [vmem:[%s2904_s0 + $0x8] sm:$0xff]  ;;  %v118_v3 = vsel %vm117_vm0, %v107_v0, 0.0  ;;  %v124_v4 = vsel %vm117_vm0, %v109_v1, 0.0  ;;  %v110_v5 = vld [vmem:[%s2904_s0 + $0x18] sm:$0xff]  ;;  %v187_v28 = vld [vmem:[#allocation5] sm:$0xff]  ;;  %s2380_s13 = smov 96  }
  0x5b   :  { %119 = vadd.xlane.f32.xlu0 %v118_v3  ;;  %125 = vadd.xlane.f32.xlu1 %v124_v4  ;;  %v121_v6 = vsel %vm117_vm0, %v108_v2, 0.0  ;;  %v127_v7 = vsel %vm117_vm0, %v110_v5, 0.0  ;;  %v188_v29 = vld [vmem:[#allocation5 + $0x8] sm:$0xff]  ;;  %v189_v30 = vld [vmem:[#allocation5 + $0x10] sm:$0xff]  ;;  %v190_v32 = vld [vmem:[#allocation5 + $0x18] sm:$0xff]  ;;  %s2381_s14 = smov 64  }
  0x5c   :  { %v1980_v31 = vpack.c.bf16 %v188_v29, %v187_v28  ;;  %v1984_v33 = vpack.c.bf16 %v190_v32, %v189_v30  ;;  %v1634_v47 = vld [vmem:[%s2913_s9] ss:$0 sm:$0xff]  ;;  %v1635_v49 = vld [vmem:[%s2913_s9 + $0x1] ss:$0 sm:$0xff]  ;;  %vm2606_vm2 = vmpackc.low %vm305_vm1, %vm305_vm1  ;;  %s2382_s15 = smov 80   ;;  %s2383_s16 = smov 112  }
  0x5d   :  { %v2630_v29 = vld [vmem:[#allocation2 + $0x18] sm:$0xff]  ;;  %s2384_s17 = smov 48   ;;  %s2385_s5 = smov 16   ;;  %vm2387_vm3 = vmmov 0  }
  0x5e   :  { %1981 = vmatprep.subr.bf16.mxu1 %v1980_v31  ;;  %s2389_s4 = smov [#allocation11]  }
  0x5f   :  { %122 = vadd.xlane.f32.xlu0 %v121_v6  ;;  %128 = vadd.xlane.f32.xlu1 %v127_v7  ;;  %s1623_s27 = sshll.u32 %s2389_s4, 4  ;;  %s1624_s27 = int_to_ptr.vmem [resolvable:$true] %s1623_s27 }
  0x60   :  { %1983 = vmatpush3.bf16.msra.mxu1 %v1980_v31  ;;  %p2348_p13 = scmp.lt.s32.totalorder %s1624_s27, %s1624_s27 }
  0x61   :  { %1985 = vmatprep.subr.bf16.mxu1 %v1984_v33 }
  0x64   :  { %1987 = vmatpush3.bf16.msra.mxu1 %v1984_v33  ;;  %v2633_v33 = vld [vmem:[#allocation2 + $0x10] sm:$0xff] }
  0xe8   :  { %v120_v8 = vpop.xlane.xlu0 %119  ;;  %v126_v9 = vpop.xlane.xlu1 %125 }
  0xe9   :  { %v131_v10 = vmul.f32 0.03125, %v120_v8  ;;  %v133_v11 = vmul.f32 0.03125, %v126_v9 }
  0xeb   :  { %v135_v12 = vsub.f32 %v107_v0, %v131_v10  ;;  %v137_v13 = vsub.f32 %v109_v1, %v133_v11  ;;  %v1636_v0 = vld [vmem:[%s2914_s10] ss:$0 sm:$0xff] }
  0xec   :  { %v123_v14 = vpop.xlane.xlu0 %122  ;;  %v129_v15 = vpop.xlane.xlu1 %128 }
  0xed   :  { %v132_v16 = vmul.f32 0.03125, %v123_v14  ;;  %v134_v17 = vmul.f32 0.03125, %v129_v15  ;;  %v139_v18 = vmul.f32 %v135_v12, %v135_v12  ;;  %v141_v19 = vmul.f32 %v137_v13, %v137_v13 }
  0xef   :  { %v136_v20 = vsub.f32 %v108_v2, %v132_v16  ;;  %v138_v21 = vsub.f32 %v110_v5, %v134_v17  ;;  %v143_v22 = vsel %vm117_vm0, %v139_v18, 0.0  ;;  %v149_v23 = vsel %vm117_vm0, %v141_v19, 0.0 }
  0xf0   :  { %144 = vadd.xlane.f32.xlu0 %v143_v22 }
  0xf1   :  { %v140_v24 = vmul.f32 %v136_v20, %v136_v20  ;;  %v142_v25 = vmul.f32 %v138_v21, %v138_v21 }
  0xf3   :  { %v146_v26 = vsel %vm117_vm0, %v140_v24, 0.0  ;;  %v152_v27 = vsel %vm117_vm0, %v142_v25, 0.0  ;;  %v2626_v24 = vld [vmem:[#allocation2] sm:$0xff] }
  0xf4   :  { %150 = vadd.xlane.f32.xlu0 %v149_v23  ;;  %147 = vadd.xlane.f32.xlu1 %v146_v26 }
  0xf8   :  { %153 = vadd.xlane.f32.xlu1 %v152_v27 }
 0x17d   :  { %v145_v34 = vpop.xlane.xlu0 %144 }
 0x17e   :  { %v155_v35 = vmul.f32 0.03125, %v145_v34 }
 0x180   :  { %v159_v36 = vadd.f32 1e-12, %v155_v35 }
 0x181   :  { %v148_v37 = vpop.xlane.xlu1 %147  ;;  %v151_v38 = vpop.xlane.xlu0 %150 }
 0x182   :  { %2169 = vrsqrt.f32 %v159_v36  ;;  %v156_v39 = vmul.f32 0.03125, %v148_v37  ;;  %v157_v40 = vmul.f32 0.03125, %v151_v38 }
 0x184   :  { %v160_v41 = vadd.f32 1e-12, %v156_v39  ;;  %v161_v42 = vadd.f32 1e-12, %v157_v40 }
 0x185   :  { %v154_v43 = vpop.xlane.xlu1 %153 }
 0x186   :  { %2171 = vrsqrt.f32 %v160_v41  ;;  %v158_v44 = vmul.f32 0.03125, %v154_v43 }
 0x187   :  { %2173 = vrsqrt.f32 %v161_v42 }
 0x188   :  { %v162_v45 = vadd.f32 1e-12, %v158_v44 }
 0x18a   :  { %2175 = vrsqrt.f32 %v162_v45 }
 0x18c   :  { %v2170_v46 = vpop.eup %2169 }
 0x18d   :  { %v167_v48 = vmul.f32 %v2170_v46, %v135_v12 }
 0x18f   :  { %v175_v50 = vmul.f32 %v1634_v47, %v167_v48 }
 0x190   :  { %v2172_v51 = vpop.eup %2171 }
 0x191   :  { %v2174_v52 = vpop.eup %2173  ;;  %v2565_v53 = vadd.f32 %v1635_v49, %v175_v50  ;;  %v168_v54 = vmul.f32 %v2172_v51, %v136_v20 }
 0x192   :  { %v169_v55 = vmul.f32 %v2174_v52, %v137_v13 }
 0x193   :  { %1795 = vmatprep.mubr.msk.f32.mxu1 %vm117_vm0, %v2565_v53  ;;  %v176_v56 = vmul.f32 %v1634_v47, %v168_v54 }
 0x194   :  { %v2176_v57 = vpop.eup %2175  ;;  %v177_v58 = vmul.f32 %v1634_v47, %v169_v55 }
 0x195   :  { %v2569_v59 = vadd.f32 %v1635_v49, %v176_v56  ;;  %v170_v60 = vmul.f32 %v2176_v57, %v138_v21  ;;  %v2624_v21 = vld [vmem:[#allocation2 + $0x8] sm:$0xff] }
 0x196   :  { %v2571_v61 = vadd.f32 %v1635_v49, %v177_v58 }
 0x197   :  { %1796 = vmatmul.mubr.msk.f32.vlgmr.msra.gmra.mrb[0].mxu1 %vm117_vm0, %v2569_v59  ;;  %v178_v62 = vmul.f32 %v1634_v47, %v170_v60 }
 0x198   :  { %1798 = vmatprep.mubr.msk.f32.mxu1 %vm117_vm0, %v2571_v61 }
 0x199   :  { %v2577_v63 = vadd.f32 %v1635_v49, %v178_v62 }
 0x19b   :  { %1799 = vmatmul.mubr.msk.f32.gmra.mrb[2].mxu1 %vm117_vm0, %v2577_v63 }
 0x26a   :  { %v1797_v1 = vpop.f32.mrb[0].mxu1 }
 0x26b   :  { %v2584_v2 = vadd.f32 %v1797_v1, %v1636_v0  ;;  %v274_v3 = vpop.f32.mrb[1].mxu1 }
 0x26c   :  { %v2586_v4 = vadd.f32 %v1636_v0, %v274_v3 }
 0x26e   :  { %v1800_v5 = vpop.f32.mrb[2].mxu1  ;;  %1809 = vmatprep.mubr.msk.f32.mxu1 %vm305_vm1, %v2586_v4  ;;  %v2592_v6 = vpack.i.bf16 %v2584_v2, %v2586_v4 }
 0x26f   :  { %v2594_v7 = vadd.f32 %v1800_v5, %v1636_v0  ;;  %v284_v8 = vpop.f32.mrb[3].mxu1 }
 0x270   :  { %v2596_v9 = vadd.f32 %v1636_v0, %v284_v8  ;;  %2130 = vrot.lane.b32.xlu0 %v2592_v6, %s2380_s13 }
 0x272   :  { %v2601_v10 = vpack.i.bf16 %v2594_v7, %v2596_v9 }
 0x274   :  { %2135 = vrot.lane.b32.xlu1 %v2601_v10, %s2380_s13 }
 0x2e2   :  { %v2131_v11 = vpop.permute.xlu0 %2130 }
 0x2e3   :  { %v2133_v12 = vunpack.i.h.bf16 %v2131_v11  ;;  %v2132_v13 = vunpack.i.l.bf16 %v2131_v11 }
 0x2e5   :  { %v1988_v15 = vpack.c.bf16 %v2133_v12, %v2132_v13 }
 0x2e6   :  { %v2136_v16 = vpop.permute.xlu1 %2135 }
 0x2e7   :  { %v2138_v17 = vunpack.i.h.bf16 %v2136_v16  ;;  %v2137_v18 = vunpack.i.l.bf16 %v2136_v16  ;;  %1990 = vmatprep.subr.msk.bf16.mxu1 %vm2606_vm2, %v1988_v15 }
 0x2e8   :  { %1993 = vmatpush3.bf16.xpose.msk.msra.mxu1 %vm2606_vm2, %v1988_v15 }
 0x2e9   :  { %v1994_v19 = vpack.c.bf16 %v2138_v17, %v2137_v18 }
 0x2eb   :  { %1996 = vmatprep.subr.msk.bf16.mxu1 %vm2606_vm2, %v1994_v19 }
 0x2f0   :  { %1999 = vmatpush3.bf16.xpose.msk.msra.mxu1 %vm2606_vm2, %v1994_v19 }
 0x2f7   :  { %1810 = vmatmul.mubr.msk.f32.vlgmr.msra.gmra.mrb[4].mxu1 %vm305_vm1, %v2584_v2 }
 0x2f8   :  { %1812 = vmatprep.mubr.msk.f32.mxu1 %vm305_vm1, %v2596_v9 }
 0x2fb   :  { %1813 = vmatmul.mubr.msk.f32.gmra.mrb[6].mxu1 %vm305_vm1, %v2594_v7 }
 0x3ca   :  { %v1811_v20 = vpop.f32.mrb[4].mxu1 }
 0x3cb   :  { %v408_v22 = vmul.f32 0.25, %v1811_v20  ;;  %v388_v23 = vpop.f32.mrb[5].mxu1 }
 0x3cc   :  { %v407_v25 = vmul.f32 0.25, %v388_v23 }
 0x3cd   :  { %v412_v26 = vadd.f32 %v408_v22, %v2624_v21 }
 0x3ce   :  { %v1814_v27 = vpop.f32.mrb[6].mxu1  ;;  %v411_v28 = vadd.f32 %v407_v25, %v2626_v24 }
 0x3cf   :  { %v410_v30 = vmul.f32 0.25, %v1814_v27  ;;  %v398_v31 = vpop.f32.mrb[7].mxu1  ;;  %v418_v32 = vsel %vm117_vm0, %v412_v26, -inf }
 0x3d0   :  { %v409_v34 = vmul.f32 0.25, %v398_v31  ;;  %419 = vmax.xlane.f32.xlu0 %v418_v32  ;;  %v415_v35 = vsel %vm117_vm0, %v411_v28, -inf }
 0x3d1   :  { %416 = vmax.xlane.f32.xlu1 %v415_v35  ;;  %v414_v36 = vadd.f32 %v410_v30, %v2630_v29 }
 0x3d2   :  { %v413_v37 = vadd.f32 %v409_v34, %v2633_v33 }
 0x3d3   :  { %v424_v38 = vsel %vm117_vm0, %v414_v36, -inf }
 0x3d4   :  { %v421_v39 = vsel %vm117_vm0, %v413_v37, -inf }
 0x3d5   :  { %425 = vmax.xlane.f32.xlu1 %v424_v38  ;;  %422 = vmax.xlane.f32.xlu0 %v421_v39 }
 0x45d   :  { %v420_v40 = vpop.xlane.xlu0 %419 }
 0x45e   :  { %v428_v41 = vsub.f32 %v412_v26, %v420_v40  ;;  %v417_v42 = vpop.xlane.xlu1 %416 }
 0x45f   :  { %v427_v43 = vsub.f32 %v411_v28, %v417_v42 }
 0x460   :  { %v433_v44 = vmul.f32 1.442695, %v428_v41 }
 0x461   :  { %v431_v45 = vmul.f32 1.442695, %v427_v43 }
 0x462   :  { %2177 = vpow2.f32 %v433_v44  ;;  %v423_v50 = vpop.xlane.xlu0 %422  ;;  %v426_v52 = vpop.xlane.xlu1 %425 }
 0x463   :  { %2179 = vpow2.f32 %v431_v45  ;;  %v429_v51 = vsub.f32 %v413_v37, %v423_v50  ;;  %v430_v55 = vsub.f32 %v414_v36, %v426_v52 }
 0x465   :  { %v435_v54 = vmul.f32 1.442695, %v429_v51  ;;  %v437_v56 = vmul.f32 1.442695, %v430_v55 }
 0x467   :  { %2181 = vpow2.f32 %v435_v54 }
 0x468   :  { %2183 = vpow2.f32 %v437_v56 }
 0x46c   :  { %v2178_v46 = vpop.eup %2177 }
 0x46d   :  { %v2180_v47 = vpop.eup %2179  ;;  %v442_v48 = vsel %vm117_vm0, %v2178_v46, 0.0 }
 0x46e   :  { %443 = vadd.xlane.f32.xlu1 %v442_v48  ;;  %v439_v49 = vsel %vm117_vm0, %v2180_v47, 0.0 }
 0x46f   :  { %440 = vadd.xlane.f32.xlu0 %v439_v49 }
 0x471   :  { %v2182_v57 = vpop.eup %2181 }
 0x472   :  { %v445_v58 = vsel %vm117_vm0, %v2182_v57, 0.0  ;;  %v2184_v60 = vpop.eup %2183 }
 0x473   :  { %v448_v62 = vsel %vm117_vm0, %v2184_v60, 0.0 }
 0x47f   :  { %2145 = vrot.lane.b32.xlu1 %v2601_v10, %s2381_s14 }
 0x483   :  { %2150 = vrot.lane.b32.xlu1 %v2592_v6, %s2382_s15 }
 0x485   :  { %2140 = vrot.lane.b32.xlu0 %v2592_v6, %s2381_s14 }
 0x487   :  { %2155 = vrot.lane.b32.xlu1 %v2601_v10, %s2382_s15 }
 0x4a4   :  { %446 = vadd.xlane.f32.xlu0 %v445_v58 }
 0x4ab   :  { %449 = vadd.xlane.f32.xlu1 %v448_v62 }
 0x4ba   :  { %568 = vrot.lane.b32.xlu0 %v2586_v4, %s2383_s16 }
 0x4bc   :  { %570 = vrot.lane.b32.xlu1 %v2584_v2, %s2383_s16 }
 0x4be   :  { %572 = vrot.lane.b32.xlu0 %v2596_v9, %s2383_s16 }
 0x4c0   :  { %574 = vrot.lane.b32.xlu1 %v2594_v7, %s2383_s16 }
 0x4fb   :  { %v444_v0 = vpop.xlane.xlu1 %443 }
 0x4fc   :  { %v441_v1 = vpop.xlane.xlu0 %440 }
 0x4fd   :  { %2185 = vrcp.f32 %v441_v1 }
 0x4fe   :  { %2187 = vrcp.f32 %v444_v0 }
 0x4ff   :  { %v2146_v3 = vpop.permute.xlu1 %2145 }
 0x500   :  { %v2141_v5 = vpop.permute.xlu0 %2140  ;;  %v2148_v8 = vunpack.i.h.bf16 %v2146_v3  ;;  %v2147_v11 = vunpack.i.l.bf16 %v2146_v3 }
 0x501   :  { %v2143_v12 = vunpack.i.h.bf16 %v2141_v5  ;;  %v2142_v13 = vunpack.i.l.bf16 %v2141_v5 }
 0x502   :  { %v2004_v17 = vpack.c.bf16 %v2148_v8, %v2147_v11 }
 0x503   :  { %v2151_v15 = vpop.permute.xlu1 %2150  ;;  %v2000_v16 = vpack.c.bf16 %v2143_v12, %v2142_v13 }
 0x504   :  { %v2153_v4 = vunpack.i.h.bf16 %v2151_v15  ;;  %v2152_v18 = vunpack.i.l.bf16 %v2151_v15 }
 0x505   :  { %2001 = vmatprep.subr.bf16.mxu0 %v2000_v16 }
 0x506   :  { %2003 = vmatpush3.bf16.msra.mxu0 %v2000_v16  ;;  %v2008_v19 = vpack.c.bf16 %v2153_v4, %v2152_v18 }
 0x507   :  { %v2186_v2 = vpop.eup %2185  ;;  %2005 = vmatprep.subr.bf16.mxu0 %v2004_v17  ;;  %v2156_v20 = vpop.permute.xlu1 %2155 }
 0x508   :  { %v2188_v7 = vpop.eup %2187  ;;  %v455_v9 = vmul.f32 %v2186_v2, %v2180_v47  ;;  %v2158_v23 = vunpack.i.h.bf16 %v2156_v20  ;;  %v2157_v25 = vunpack.i.l.bf16 %v2156_v20 }
 0x509   :  { %v456_v22 = vmul.f32 %v2188_v7, %v2178_v46 }
 0x50a   :  { %2007 = vmatpush3.bf16.msra.mxu0 %v2004_v17  ;;  %1823 = vmatprep.mubr.msk.f32.mxu0 %vm117_vm0, %v455_v9  ;;  %v2014_v26 = vpack.c.bf16 %v2158_v23, %v2157_v25 }
 0x50b   :  { %2010 = vmatprep.subr.msk.bf16.mxu0 %vm2606_vm2, %v2008_v19 }
 0x50d   :  { %1824 = vmatmul.mubr.msk.f32.vlgmr.msra.gmra.mrb[0].mxu0 %vm117_vm0, %v456_v22 }
 0x513   :  { %2013 = vmatpush3.bf16.xpose.msk.msra.mxu0 %vm2606_vm2, %v2008_v19 }
 0x514   :  { %2016 = vmatprep.subr.msk.bf16.mxu0 %vm2606_vm2, %v2014_v26 }
 0x51b   :  { %2019 = vmatpush3.bf16.xpose.msk.msra.mxu0 %vm2606_vm2, %v2014_v26 }
 0x531   :  { %v447_v27 = vpop.xlane.xlu0 %446 }
 0x532   :  { %2189 = vrcp.f32 %v447_v27 }
 0x535   :  { %v569_v34 = vpop.permute.xlu0 %568 }
 0x538   :  { %v450_v28 = vpop.xlane.xlu1 %449 }
 0x539   :  { %2191 = vrcp.f32 %v450_v28  ;;  %v573_v37 = vpop.permute.xlu0 %572 }
 0x53c   :  { %v2190_v30 = vpop.eup %2189  ;;  %v571_v36 = vpop.permute.xlu1 %570 }
 0x53d   :  { %v457_v31 = vmul.f32 %v2190_v30, %v2182_v57 }
 0x53f   :  { %1826 = vmatprep.mubr.msk.f32.mxu0 %vm117_vm0, %v457_v31 }
 0x540   :  { %v575_v14 = vpop.permute.xlu1 %574 }
 0x543   :  { %v2192_v32 = vpop.eup %2191 }
 0x544   :  { %v458_v35 = vmul.f32 %v2192_v32, %v2184_v60 }
 0x546   :  { %1827 = vmatmul.mubr.msk.f32.gmra.mrb[2].mxu0 %vm117_vm0, %v458_v35 }
 0x547   :  { %1837 = vmatprep.mubr.msk.f32.mxu0 %vm305_vm1, %v569_v34 }
 0x54a   :  { %1838 = vmatmul.mubr.msk.f32.vlgmr.msra.gmra.mrb[4].mxu0 %vm305_vm1, %v571_v36 }
 0x54b   :  { %1840 = vmatprep.mubr.msk.f32.mxu0 %vm305_vm1, %v573_v37 }
 0x54e   :  { %1841 = vmatmul.mubr.msk.f32.gmra.mrb[6].mxu0 %vm305_vm1, %v575_v14 }
 0x5e0   :  { %v2668_v38 = vpop.f32.mrb[0].mxu0 }
 0x5e1   :  { %v2670_v39 = vpop.f32.mrb[1].mxu0 }
 0x619   :  { %v2672_v40 = vpop.f32.mrb[2].mxu0 }
 0x61a   :  { %v2674_v41 = vpop.f32.mrb[3].mxu0 }
 0x61d   :  { %v1839_v42 = vpop.f32.mrb[4].mxu0 }
 0x61e   :  { %v686_v43 = vmul.f32 0.25, %v1839_v42  ;;  %v666_v44 = vpop.f32.mrb[5].mxu0  ;;  %v866_v42 = vld [vmem:[#allocation7] sm:$0xff] }
 0x61f   :  { %v685_v45 = vmul.f32 0.25, %v666_v44 }
 0x620   :  { %v690_v46 = vadd.f32 %v686_v43, %v2624_v21  ;;  %v867_v43 = vld [vmem:[#allocation7 + $0x8] sm:$0xff] }
 0x621   :  { %v1842_v47 = vpop.f32.mrb[6].mxu0  ;;  %v689_v48 = vadd.f32 %v685_v45, %v2626_v24  ;;  %v2028_v44 = vpack.c.bf16 %v867_v43, %v866_v42  ;;  %v868_v45 = vld [vmem:[#allocation7 + $0x10] sm:$0xff] }
 0x622   :  { %v676_v49 = vpop.f32.mrb[7].mxu0  ;;  %v696_v50 = vsel %vm117_vm0, %v690_v46, -inf  ;;  %v688_v51 = vmul.f32 0.25, %v1842_v47 }
 0x623   :  { %v687_v52 = vmul.f32 0.25, %v676_v49  ;;  %697 = vmax.xlane.f32.xlu1 %v696_v50  ;;  %v693_v54 = vsel %vm117_vm0, %v689_v48, -inf }
 0x624   :  { %694 = vmax.xlane.f32.xlu0 %v693_v54  ;;  %v692_v57 = vadd.f32 %v688_v51, %v2630_v29 }
 0x625   :  { %v691_v55 = vadd.f32 %v687_v52, %v2633_v33 }
 0x626   :  { %v702_v21 = vsel %vm117_vm0, %v692_v57, -inf }
 0x627   :  { %v699_v56 = vsel %vm117_vm0, %v691_v55, -inf }
 0x628   :  { %700 = vmax.xlane.f32.xlu0 %v699_v56 }
 0x62c   :  { %703 = vmax.xlane.f32.xlu0 %v702_v21 }
 0x6b0   :  { %v698_v24 = vpop.xlane.xlu1 %697 }
 0x6b1   :  { %v706_v58 = vsub.f32 %v690_v46, %v698_v24  ;;  %v695_v60 = vpop.xlane.xlu0 %694  ;;  %v869_v46 = vld [vmem:[#allocation7 + $0x18] sm:$0xff] }
 0x6b2   :  { %v705_v62 = vsub.f32 %v689_v48, %v695_v60  ;;  %v2032_v47 = vpack.c.bf16 %v869_v46, %v868_v45 }
 0x6b3   :  { %v711_v0 = vmul.f32 1.442695, %v706_v58 }
 0x6b4   :  { %v709_v1 = vmul.f32 1.442695, %v705_v62 }
 0x6b5   :  { %2193 = vpow2.f32 %v711_v0  ;;  %v701_v3 = vpop.xlane.xlu0 %700 }
 0x6b6   :  { %2195 = vpow2.f32 %v709_v1  ;;  %v707_v5 = vsub.f32 %v691_v55, %v701_v3 }
 0x6b8   :  { %v713_v8 = vmul.f32 1.442695, %v707_v5 }
 0x6b9   :  { %v704_v33 = vpop.xlane.xlu0 %703 }
 0x6ba   :  { %2197 = vpow2.f32 %v713_v8  ;;  %v708_v11 = vsub.f32 %v692_v57, %v704_v33 }
 0x6bc   :  { %v715_v12 = vmul.f32 1.442695, %v708_v11 }
 0x6be   :  { %2199 = vpow2.f32 %v715_v12 }
 0x6bf   :  { %v2194_v29 = vpop.eup %2193 }
 0x6c0   :  { %v2196_v13 = vpop.eup %2195  ;;  %v720_v15 = vsel %vm117_vm0, %v2194_v29, 0.0 }
 0x6c1   :  { %721 = vadd.xlane.f32.xlu1 %v720_v15  ;;  %v717_v16 = vsel %vm117_vm0, %v2196_v13, 0.0 }
 0x6c2   :  { %718 = vadd.xlane.f32.xlu0 %v717_v16 }
 0x6c4   :  { %v2198_v17 = vpop.eup %2197 }
 0x6c5   :  { %v723_v4 = vsel %vm117_vm0, %v2198_v17, 0.0 }
 0x6c6   :  { %724 = vadd.xlane.f32.xlu0 %v723_v4 }
 0x6c8   :  { %v2200_v18 = vpop.eup %2199 }
 0x6c9   :  { %v726_v2 = vsel %vm117_vm0, %v2200_v18, 0.0 }
 0x6ca   :  { %727 = vadd.xlane.f32.xlu1 %v726_v2 }
 0x6db   :  { %2165 = vrot.lane.b32.xlu1 %v2601_v10, %s2384_s17 }
 0x6dc   :  { %2160 = vrot.lane.b32.xlu0 %v2592_v6, %s2384_s17 }
 0x74e   :  { %v722_v9 = vpop.xlane.xlu1 %721 }
 0x74f   :  { %v719_v7 = vpop.xlane.xlu0 %718 }
 0x750   :  { %2201 = vrcp.f32 %v719_v7 }
 0x751   :  { %2203 = vrcp.f32 %v722_v9 }
 0x753   :  { %v725_v19 = vpop.xlane.xlu0 %724 }
 0x754   :  { %2205 = vrcp.f32 %v725_v19 }
 0x757   :  { %v728_v20 = vpop.xlane.xlu1 %727  ;;  %v2161_v22 = vpop.permute.xlu0 %2160 }
 0x758   :  { %v2163_v23 = vunpack.i.h.bf16 %v2161_v22  ;;  %v2162_v25 = vunpack.i.l.bf16 %v2161_v22  ;;  %2207 = vrcp.f32 %v728_v20 }
 0x75a   :  { %v2202_v26 = vpop.eup %2201  ;;  %v2020_v27 = vpack.c.bf16 %v2163_v23, %v2162_v25 }
 0x75b   :  { %v2166_v28 = vpop.permute.xlu1 %2165  ;;  %v733_v30 = vmul.f32 %v2202_v26, %v2196_v13  ;;  %v2204_v10 = vpop.eup %2203 }
 0x75c   :  { %v2168_v31 = vunpack.i.h.bf16 %v2166_v28  ;;  %v2167_v32 = vunpack.i.l.bf16 %v2166_v28  ;;  %2021 = vmatprep.subr.bf16.mxu1 %v2020_v27  ;;  %v734_v35 = vmul.f32 %v2204_v10, %v2194_v29  ;;  %v1048_v10 = vld [vmem:[#allocation8 + $0x10] sm:$0xff] }
 0x75d   :  { %2023 = vmatpush3.bf16.msra.mxu1 %v2020_v27  ;;  %1851 = vmatprep.mubr.msk.f32.mxu1 %vm117_vm0, %v733_v30 }
 0x75e   :  { %v2024_v6 = vpack.c.bf16 %v2168_v31, %v2167_v32  ;;  %v2206_v34 = vpop.eup %2205  ;;  %v1046_v31 = vld [vmem:[#allocation8] sm:$0xff]  ;;  %v1047_v32 = vld [vmem:[#allocation8 + $0x8] sm:$0xff] }
 0x75f   :  { %v735_v37 = vmul.f32 %v2206_v34, %v2198_v17  ;;  %v1049_v34 = vld [vmem:[#allocation8 + $0x18] sm:$0xff] }
 0x760   :  { %2025 = vmatprep.subr.bf16.mxu1 %v2024_v6 }
 0x761   :  { %2027 = vmatpush3.bf16.msra.mxu1 %v2024_v6  ;;  %v2036_v6 = vpack.c.bf16 %v1047_v32, %v1046_v31 }
 0x762   :  { %v2208_v36 = vpop.eup %2207  ;;  %2029 = vmatprep.subr.bf16.mxu1 %v2028_v44 }
 0x763   :  { %v736_v14 = vmul.f32 %v2208_v36, %v2200_v18  ;;  %2037 = vmatprep.subr.bf16.mxu0 %v2036_v6  ;;  %v1188_v36 = vld [vmem:[%s2910_s6] sm:$0xff] }
 0x764   :  { %1852 = vmatmul.mubr.msk.f32.vlgmr.msra.gmra.mrb[8].mxu1 %vm117_vm0, %v734_v35  ;;  %v2040_v35 = vpack.c.bf16 %v1049_v34, %v1048_v10  ;;  %2039 = vmatpush3.bf16.msra.mxu0 %v2036_v6 }
 0x765   :  { %1854 = vmatprep.mubr.msk.f32.mxu1 %vm117_vm0, %v735_v37  ;;  %2031 = vmatpush3.bf16.msra.mxu1 %v2028_v44  ;;  %v1189_v37 = vld [vmem:[%s2910_s6 + $0x8] sm:$0xff] }
 0x766   :  { %2033 = vmatprep.subr.bf16.mxu1 %v2032_v47  ;;  %2041 = vmatprep.subr.bf16.mxu0 %v2040_v35 }
 0x768   :  { %1855 = vmatmul.mubr.msk.f32.gmra.mrb[10].mxu1 %vm117_vm0, %v736_v14  ;;  %2043 = vmatpush3.bf16.msra.mxu0 %v2040_v35  ;;  %v2044_v14 = vpack.c.bf16 %v1189_v37, %v1188_v36 }
 0x769   :  { %2035 = vmatpush3.bf16.msra.mxu1 %v2032_v47 }
 0x76a   :  { %2045 = vmatprep.subr.bf16.mxu1 %v2044_v14 }
 0x837   :  { %v1853_v48 = vpop.f32.mrb[8].mxu1 }
 0x838   :  { %v827_v49 = vpop.f32.mrb[9].mxu1 }
 0x839   :  { %850 = vrot.lane.b32.xlu1 %v827_v49, %s2385_s5 }
 0x83b   :  { %v1856_v50 = vpop.f32.mrb[10].mxu1 }
 0x83c   :  { %v837_v51 = vpop.f32.mrb[11].mxu1 }
 0x83d   :  { %852 = vrot.lane.b32.xlu1 %v1853_v48, %s2385_s5  ;;  %854 = vrot.lane.b32.xlu0 %v837_v51, %s2385_s5 }
 0x841   :  { %856 = vrot.lane.b32.xlu1 %v1856_v50, %s2385_s5 }
 0x8ab   :  { %v851_v52 = vpop.permute.xlu1 %850 }
 0x8ac   :  { %v862_v54 = vsel %vm305_vm1, %v2670_v39, %v851_v52  ;;  %v1665_v39 = vld [vmem:[%s2913_s9 + $0x2] ss:$0 sm:$0xff] }
 0x8ad   :  { %1865 = vmatprep.mubr.msk.f32.mxu1 %vm117_vm0, %v862_v54 }
 0x8af   :  { %v853_v55 = vpop.permute.xlu1 %852  ;;  %v855_v56 = vpop.permute.xlu0 %854 }
 0x8b0   :  { %v863_v57 = vsel %vm305_vm1, %v2668_v38, %v853_v55  ;;  %v864_v21 = vsel %vm305_vm1, %v2674_v41, %v855_v56  ;;  %v1670_v56 = vld [vmem:[%s2913_s9 + $0x3] ss:$0 sm:$0xff] }
 0x8b1   :  { %1866 = vmatmul.mubr.msk.f32.vlgmr.msra.gmra.mrb[12].mxu1 %vm117_vm0, %v863_v57 }
 0x8b2   :  { %1868 = vmatprep.mubr.msk.f32.mxu1 %vm117_vm0, %v864_v21  ;;  %2047 = vmatpush3.bf16.msra.mxu1 %v2044_v14 }
 0x8b3   :  { %v857_v24 = vpop.permute.xlu1 %856 }
 0x8b4   :  { %v865_v58 = vsel %vm305_vm1, %v2672_v40, %v857_v24 }
 0x8b5   :  { %1869 = vmatmul.mubr.msk.f32.gmra.mrb[14].mxu1 %vm117_vm0, %v865_v58  ;;  %v1671_v58 = vld [vmem:[%s2913_s9 + $0x4] ss:$0 sm:$0xff] }
 0x984   :  { %v1867_v60 = vpop.f32.mrb[12].mxu1 }
 0x985   :  { %v959_v62 = vadd.f32 %v1867_v60, %v1665_v39  ;;  %v953_v38 = vpop.f32.mrb[13].mxu1 }
 0x986   :  { %v954_v0 = vadd.f32 %v1665_v39, %v953_v38 }
 0x987   :  { %v973_v41 = vadd.f32 %v959_v62, %v2569_v59 }
 0x988   :  { %v1870_v1 = vpop.f32.mrb[14].mxu1  ;;  %v972_v3 = vadd.f32 %v954_v0, %v2565_v53 }
 0x989   :  { %v963_v5 = vpop.f32.mrb[15].mxu1  ;;  %v981_v8 = vsel %vm117_vm0, %v973_v41, 0.0  ;;  %v969_v33 = vadd.f32 %v1870_v1, %v1665_v39 }
 0x98a   :  { %v964_v40 = vadd.f32 %v1665_v39, %v963_v5  ;;  %982 = vadd.xlane.f32.xlu1 %v981_v8  ;;  %v978_v11 = vsel %vm117_vm0, %v972_v3, 0.0 }
 0x98b   :  { %979 = vadd.xlane.f32.xlu0 %v978_v11  ;;  %v975_v13 = vadd.f32 %v969_v33, %v2577_v63  ;;  %v1190_v11 = vld [vmem:[%s2910_s6 + $0x10] sm:$0xff] }
 0x98c   :  { %v974_v12 = vadd.f32 %v964_v40, %v2571_v61 }
 0x98d   :  { %v987_v59 = vsel %vm117_vm0, %v975_v13, 0.0 }
 0x98e   :  { %v984_v29 = vsel %vm117_vm0, %v974_v12, 0.0 }
 0x98f   :  { %985 = vadd.xlane.f32.xlu0 %v984_v29 }
 0x993   :  { %988 = vadd.xlane.f32.xlu0 %v987_v59  ;;  %v1193_v59 = vld [vmem:[%s2910_s6 + $0x28] sm:$0xff] }
 0xa17   :  { %v983_v53 = vpop.xlane.xlu1 %982 }
 0xa18   :  { %v991_v15 = vmul.f32 0.03125, %v983_v53  ;;  %v980_v16 = vpop.xlane.xlu0 %979 }
 0xa19   :  { %v990_v17 = vmul.f32 0.03125, %v980_v16  ;;  %v1195_v16 = vld [vmem:[%s2910_s6 + $0x38] sm:$0xff] }
 0xa1a   :  { %v995_v4 = vsub.f32 %v973_v41, %v991_v15  ;;  %v1194_v15 = vld [vmem:[%s2910_s6 + $0x30] sm:$0xff] }
 0xa1b   :  { %v994_v18 = vsub.f32 %v972_v3, %v990_v17  ;;  %v2056_v17 = vpack.c.bf16 %v1195_v16, %v1194_v15  ;;  %v1677_v15 = vld [vmem:[%s2913_s9 + $0x5] ss:$0 sm:$0xff] }
 0xa1c   :  { %v986_v2 = vpop.xlane.xlu0 %985  ;;  %v999_v7 = vmul.f32 %v995_v4, %v995_v4 }
 0xa1d   :  { %v992_v9 = vmul.f32 0.03125, %v986_v2  ;;  %v998_v19 = vmul.f32 %v994_v18, %v994_v18 }
 0xa1e   :  { %v1005_v61 = vsel %vm117_vm0, %v999_v7, 0.0  ;;  %v1198_v7 = vld [vmem:[%s2910_s6 + $0x50] sm:$0xff] }
 0xa1f   :  { %v996_v20 = vsub.f32 %v974_v12, %v992_v9  ;;  %1006 = vadd.xlane.f32.xlu1 %v1005_v61  ;;  %v1002_v63 = vsel %vm117_vm0, %v998_v19, 0.0  ;;  %v1191_v12 = vld [vmem:[%s2910_s6 + $0x18] sm:$0xff]  ;;  %v1200_v61 = vld [vmem:[%s2910_s6 + $0x60] sm:$0xff] }
 0xa20   :  { %1003 = vadd.xlane.f32.xlu0 %v1002_v63  ;;  %v989_v22 = vpop.xlane.xlu0 %988  ;;  %v2048_v29 = vpack.c.bf16 %v1191_v12, %v1190_v11  ;;  %v1199_v9 = vld [vmem:[%s2910_s6 + $0x58] sm:$0xff] }
 0xa21   :  { %v993_v23 = vmul.f32 0.03125, %v989_v22  ;;  %v1000_v25 = vmul.f32 %v996_v20, %v996_v20  ;;  %v2064_v19 = vpack.c.bf16 %v1199_v9, %v1198_v7  ;;  %v1202_v22 = vld [vmem:[%s2910_s6 + $0x70] sm:$0xff] }
 0xa22   :  { %2049 = vmatprep.subr.bf16.mxu1 %v2048_v29 }
 0xa23   :  { %v997_v26 = vsub.f32 %v975_v13, %v993_v23  ;;  %v1008_v27 = vsel %vm117_vm0, %v1000_v25, 0.0  ;;  %2051 = vmatpush3.bf16.msra.mxu1 %v2048_v29  ;;  %v1192_v13 = vld [vmem:[%s2910_s6 + $0x20] sm:$0xff]  ;;  %v1203_v23 = vld [vmem:[%s2910_s6 + $0x78] sm:$0xff] }
 0xa24   :  { %1009 = vadd.xlane.f32.xlu0 %v1008_v27  ;;  %v2052_v53 = vpack.c.bf16 %v1193_v59, %v1192_v13  ;;  %v2072_v25 = vpack.c.bf16 %v1203_v23, %v1202_v22 }
 0xa25   :  { %v1001_v28 = vmul.f32 %v997_v26, %v997_v26 }
 0xa26   :  { %2053 = vmatprep.subr.bf16.mxu1 %v2052_v53 }
 0xa27   :  { %v1011_v30 = vsel %vm117_vm0, %v1001_v28, 0.0  ;;  %2055 = vmatpush3.bf16.msra.mxu1 %v2052_v53 }
 0xa28   :  { %1012 = vadd.xlane.f32.xlu1 %v1011_v30  ;;  %2057 = vmatprep.subr.bf16.mxu1 %v2056_v17 }
 0xa2b   :  { %2059 = vmatpush3.bf16.msra.mxu1 %v2056_v17 }
 0xaac   :  { %v1007_v42 = vpop.xlane.xlu1 %1006 }
 0xaad   :  { %v1015_v43 = vmul.f32 0.03125, %v1007_v42  ;;  %v1004_v44 = vpop.xlane.xlu0 %1003 }
 0xaae   :  { %v1014_v45 = vmul.f32 0.03125, %v1004_v44 }
 0xaaf   :  { %v1019_v46 = vadd.f32 1e-12, %v1015_v43 }
 0xab0   :  { %v1018_v47 = vadd.f32 1e-12, %v1014_v45 }
 0xab1   :  { %2209 = vrsqrt.f32 %v1019_v46  ;;  %v1010_v48 = vpop.xlane.xlu0 %1009 }
 0xab2   :  { %2211 = vrsqrt.f32 %v1018_v47  ;;  %v1016_v49 = vmul.f32 0.03125, %v1010_v48 }
 0xab4   :  { %v1020_v50 = vadd.f32 1e-12, %v1016_v49 }
 0xab5   :  { %v1013_v51 = vpop.xlane.xlu1 %1012 }
 0xab6   :  { %2213 = vrsqrt.f32 %v1020_v50  ;;  %v1017_v52 = vmul.f32 0.03125, %v1013_v51 }
 0xab8   :  { %v1021_v54 = vadd.f32 1e-12, %v1017_v52 }
 0xaba   :  { %2215 = vrsqrt.f32 %v1021_v54 }
 0xabb   :  { %v2210_v55 = vpop.eup %2209 }
 0xabc   :  { %v2212_v57 = vpop.eup %2211  ;;  %v1027_v21 = vmul.f32 %v2210_v55, %v995_v4  ;;  %v1196_v4 = vld [vmem:[%s2910_s6 + $0x40] sm:$0xff] }
 0xabd   :  { %v1026_v24 = vmul.f32 %v2212_v57, %v994_v18  ;;  %v1197_v18 = vld [vmem:[%s2910_s6 + $0x48] sm:$0xff] }
 0xabe   :  { %v1035_v39 = vmul.f32 %v1670_v56, %v1027_v21  ;;  %v2060_v2 = vpack.c.bf16 %v1197_v18, %v1196_v4 }
 0xabf   :  { %v1034_v60 = vmul.f32 %v1670_v56, %v1026_v24 }
 0xac0   :  { %v2214_v62 = vpop.eup %2213  ;;  %v2735_v41 = vadd.f32 %v1671_v58, %v1035_v39  ;;  %2061 = vmatprep.subr.bf16.mxu1 %v2060_v2 }
 0xac1   :  { %v2733_v38 = vadd.f32 %v1671_v58, %v1034_v60  ;;  %v1028_v0 = vmul.f32 %v2214_v62, %v996_v20  ;;  %v1201_v20 = vld [vmem:[%s2910_s6 + $0x68] sm:$0xff]  ;;  %2063 = vmatpush3.bf16.msra.mxu1 %v2060_v2 }
 0xac2   :  { %2065 = vmatprep.subr.bf16.mxu1 %v2064_v19  ;;  %v2068_v63 = vpack.c.bf16 %v1201_v20, %v1200_v61 }
 0xac3   :  { %1879 = vmatprep.mubr.msk.f32.mxu0 %vm117_vm0, %v2733_v38  ;;  %v1036_v1 = vmul.f32 %v1670_v56, %v1028_v0 }
 0xac4   :  { %v2216_v3 = vpop.eup %2215  ;;  %1880 = vmatmul.mubr.msk.f32.vlgmr.msra.gmra.mrb[8].mxu0 %vm117_vm0, %v2735_v41 }
 0xac5   :  { %v2741_v5 = vadd.f32 %v1671_v58, %v1036_v1  ;;  %v1029_v8 = vmul.f32 %v2216_v3, %v997_v26  ;;  %2067 = vmatpush3.bf16.msra.mxu1 %v2064_v19  ;;  %v1672_v26 = vld [vmem:[%s2914_s10 + $0x1] ss:$0 sm:$0xff] }
 0xac6   :  { %2069 = vmatprep.subr.bf16.mxu1 %v2068_v63 }
 0xac7   :  { %1882 = vmatprep.mubr.msk.f32.mxu0 %vm117_vm0, %v2741_v5  ;;  %v1037_v33 = vmul.f32 %v1670_v56, %v1029_v8 }
 0xac9   :  { %v2745_v40 = vadd.f32 %v1671_v58, %v1037_v33  ;;  %2071 = vmatpush3.bf16.msra.mxu1 %v2068_v63 }
 0xaca   :  { %2073 = vmatprep.subr.bf16.mxu1 %v2072_v25 }
 0xacb   :  { %1883 = vmatmul.mubr.msk.f32.gmra.mrb[10].mxu0 %vm117_vm0, %v2745_v40 }
 0xacd   :  { %2075 = vmatpush3.bf16.msra.mxu1 %v2072_v25 }
 0xb97   :  { %v1881_v27 = vpop.f32.mrb[8].mxu0 }
 0xb98   :  { %v1139_v28 = vadd.f32 %v1881_v27, %v1672_v26  ;;  %v1133_v30 = vpop.f32.mrb[9].mxu0 }
 0xb99   :  { %v1134_v31 = vadd.f32 %v1672_v26, %v1133_v30 }
 0xb9a   :  { %v1157_v32 = vmul.f32 0.044715, %v1139_v28  ;;  %v1153_v0 = vmul.f32 0.5, %v1139_v28 }
 0xb9b   :  { %v1156_v6 = vmul.f32 0.044715, %v1134_v31  ;;  %v1152_v60 = vmul.f32 0.5, %v1134_v31 }
 0xb9c   :  { %v1161_v10 = vmul.f32 %v1157_v32, %v1139_v28 }
 0xb9d   :  { %v1160_v34 = vmul.f32 %v1156_v6, %v1134_v31 }
 0xb9e   :  { %v1165_v35 = vmul.f32 %v1161_v10, %v1139_v28  ;;  %v1884_v36 = vpop.f32.mrb[10].mxu0 }
 0xb9f   :  { %v1149_v37 = vadd.f32 %v1884_v36, %v1672_v26  ;;  %v1143_v14 = vpop.f32.mrb[11].mxu0  ;;  %v1164_v42 = vmul.f32 %v1160_v34, %v1134_v31 }
 0xba0   :  { %v1169_v43 = vadd.f32 %v1165_v35, %v1139_v28  ;;  %v1144_v44 = vadd.f32 %v1672_v26, %v1143_v14 }
 0xba1   :  { %v1159_v45 = vmul.f32 0.044715, %v1149_v37  ;;  %v1168_v46 = vadd.f32 %v1164_v42, %v1134_v31  ;;  %v1155_v13 = vmul.f32 0.5, %v1149_v37 }
 0xba2   :  { %v1173_v47 = vmul.f32 0.7978846, %v1169_v43  ;;  %v1158_v48 = vmul.f32 0.044715, %v1144_v44  ;;  %v1154_v12 = vmul.f32 0.5, %v1144_v44 }
 0xba3   :  { %v1163_v49 = vmul.f32 %v1159_v45, %v1149_v37  ;;  %v1172_v50 = vmul.f32 0.7978846, %v1168_v46 }
 0xba4   :  { %2217 = vtanh.f32 %v1173_v47  ;;  %v1162_v51 = vmul.f32 %v1158_v48, %v1144_v44  ;;  %v2386_v47 = vmov 0.0|0.0   ;;  %v2388_v48 = vmov 0.0  }
 0xba5   :  { %2219 = vtanh.f32 %v1172_v50  ;;  %v1167_v52 = vmul.f32 %v1163_v49, %v1149_v37  ;;  %2076 = vmatprep.subr.bf16.mxu0 %v2386_v47  ;;  %1931 = vmatprep.mubr.msk.f32.mxu0 %vm2387_vm3, %v2388_v48 }
 0xba6   :  { %v1166_v54 = vmul.f32 %v1162_v51, %v1144_v44 }
 0xba7   :  { %v1171_v55 = vadd.f32 %v1167_v52, %v1149_v37 }
 0xba8   :  { %v1170_v56 = vadd.f32 %v1166_v54, %v1144_v44 }
 0xba9   :  { %v1175_v57 = vmul.f32 0.7978846, %v1171_v55 }
 0xbaa   :  { %v1174_v21 = vmul.f32 0.7978846, %v1170_v56 }
 0xbab   :  { %2221 = vtanh.f32 %v1175_v57 }
 0xbac   :  { %2223 = vtanh.f32 %v1174_v21 }
 0xbae   :  { %v2218_v24 = vpop.eup %2217 }
 0xbaf   :  { %v2220_v58 = vpop.eup %2219  ;;  %v1181_v39 = vadd.f32 1.0, %v2218_v24 }
 0xbb0   :  { %v1180_v62 = vadd.f32 1.0, %v2220_v58 }
 0xbb1   :  { %v1185_v3 = vmul.f32 %v1181_v39, %v1153_v0 }
 0xbb2   :  { %v1184_v1 = vmul.f32 %v1180_v62, %v1152_v60  ;;  %v1678_v62 = vld [vmem:[%s2913_s9 + $0x6] ss:$0 sm:$0xff] }
 0xbb4   :  { %1917 = vmatprep.mubr.f32.mxu1 %v1184_v1 }
 0xbb5   :  { %v2222_v8 = vpop.eup %2221  ;;  %1918 = vmatmul.mubr.f32.vlgmr.msra.gmra.mrb[16].mxu1 %v1185_v3 }
 0xbb6   :  { %v2224_v33 = vpop.eup %2223  ;;  %v1183_v11 = vadd.f32 1.0, %v2222_v8  ;;  %v1679_v8 = vld [vmem:[%s2913_s9 + $0x7] ss:$0 sm:$0xff] }
 0xbb7   :  { %v1182_v29 = vadd.f32 1.0, %v2224_v33 }
 0xbb8   :  { %v1187_v53 = vmul.f32 %v1183_v11, %v1155_v13 }
 0xbb9   :  { %v1186_v59 = vmul.f32 %v1182_v29, %v1154_v12 }
 0xbbb   :  { %1920 = vmatprep.mubr.f32.mxu1 %v1186_v59 }
 0xbbc   :  { %1921 = vmatmul.mubr.f32.gmra.mrb[18].mxu1 %v1187_v53 }
 0xc88   :  { %v1919_v16 = vpop.f32.mrb[16].mxu1 }
 0xc89   :  { %v1281_v17 = vadd.f32 %v1919_v16, %v1677_v15  ;;  %v1275_v4 = vpop.f32.mrb[17].mxu1 }
 0xc8a   :  { %v1276_v18 = vadd.f32 %v1677_v15, %v1275_v4 }
 0xc8b   :  { %v1295_v2 = vadd.f32 %v1281_v17, %v2735_v41 }
 0xc8c   :  { %v1294_v7 = vadd.f32 %v1276_v18, %v2733_v38 }
 0xc8d   :  { %v1303_v9 = vsel %vm117_vm0, %v1295_v2, 0.0 }
 0xc8e   :  { %1304 = vadd.xlane.f32.xlu1 %v1303_v9  ;;  %v1300_v19 = vsel %vm117_vm0, %v1294_v7, 0.0  ;;  %v1443_v9 = vld [vmem:[#allocation10 + $0x8] sm:$0xff] }
 0xc8f   :  { %1301 = vadd.xlane.f32.xlu0 %v1300_v19  ;;  %v1922_v61 = vpop.f32.mrb[18].mxu1 }
 0xc90   :  { %v1291_v20 = vadd.f32 %v1922_v61, %v1677_v15  ;;  %v1285_v63 = vpop.f32.mrb[19].mxu1  ;;  %v1368_v61 = vld [vmem:[%s2906_s2] sm:$0xf] }
 0xc91   :  { %v1286_v22 = vadd.f32 %v1677_v15, %v1285_v63  ;;  %v1444_v63 = vld [vmem:[#allocation10 + $0x10] sm:$0xff] }
 0xc92   :  { %v1297_v23 = vadd.f32 %v1291_v20, %v2745_v40 }
 0xc93   :  { %v1296_v25 = vadd.f32 %v1286_v22, %v2741_v5  ;;  %v1445_v22 = vld [vmem:[#allocation10 + $0x18] sm:$0xff] }
 0xc94   :  { %v1309_v26 = vsel %vm117_vm0, %v1297_v23, 0.0 }
 0xc95   :  { %1310 = vadd.xlane.f32.xlu1 %v1309_v26  ;;  %v1306_v41 = vsel %vm117_vm0, %v1296_v25, 0.0  ;;  %v1526_v26 = vld [vmem:[%s2912_s8 + $0x8] sm:$0xff] }
 0xc96   :  { %1307 = vadd.xlane.f32.xlu0 %v1306_v41 }
 0xd1b   :  { %v1305_v38 = vpop.xlane.xlu1 %1304 }
 0xd1c   :  { %v1313_v27 = vmul.f32 0.03125, %v1305_v38  ;;  %v1302_v28 = vpop.xlane.xlu0 %1301  ;;  %v1527_v38 = vld [vmem:[%s2912_s8 + $0x10] sm:$0xff] }
 0xd1d   :  { %v1312_v30 = vmul.f32 0.03125, %v1302_v28 }
 0xd1e   :  { %v1317_v31 = vsub.f32 %v1295_v2, %v1313_v27  ;;  %v1528_v27 = vld [vmem:[%s2912_s8 + $0x18] sm:$0xff] }
 0xd1f   :  { %v1316_v32 = vsub.f32 %v1294_v7, %v1312_v30  ;;  %v1442_v7 = vld [vmem:[#allocation10] sm:$0xff] }
 0xd20   :  { %v1321_v6 = vmul.f32 %v1317_v31, %v1317_v31  ;;  %v2083_v20 = vpack.c.bf16 %v1443_v9, %v1442_v7 }
 0xd21   :  { %v1320_v10 = vmul.f32 %v1316_v32, %v1316_v32 }
 0xd22   :  { %v1311_v34 = vpop.xlane.xlu1 %1310  ;;  %v1327_v35 = vsel %vm117_vm0, %v1321_v6, 0.0  ;;  %v1530_v6 = vld [vmem:[%s2912_s8 + $0x28] sm:$0xff] }
 0xd23   :  { %v1315_v40 = vmul.f32 0.03125, %v1311_v34  ;;  %1328 = vadd.xlane.f32.xlu1 %v1327_v35  ;;  %v1308_v5 = vpop.xlane.xlu0 %1307  ;;  %v1324_v36 = vsel %vm117_vm0, %v1320_v10, 0.0  ;;  %v1531_v34 = vld [vmem:[%s2912_s8 + $0x30] sm:$0xff]  ;;  %v1532_v35 = vld [vmem:[%s2912_s8 + $0x38] sm:$0xff] }
 0xd24   :  { %v1314_v37 = vmul.f32 0.03125, %v1308_v5  ;;  %1325 = vadd.xlane.f32.xlu0 %v1324_v36  ;;  %v1533_v5 = vld [vmem:[%s2912_s8 + $0x40] sm:$0xff]  ;;  %v1534_v36 = vld [vmem:[%s2912_s8 + $0x48] sm:$0xff] }
 0xd25   :  { %v1319_v14 = vsub.f32 %v1297_v23, %v1315_v40  ;;  %v2086_v23 = vpack.c.bf16 %v1445_v22, %v1444_v63  ;;  %v2098_v40 = vpack.c.bf16 %v1532_v35, %v1531_v34 }
 0xd26   :  { %v1318_v42 = vsub.f32 %v1296_v25, %v1314_v37  ;;  %v1525_v25 = vld [vmem:[%s2912_s8] sm:$0xff]  ;;  %v2101_v37 = vpack.c.bf16 %v1534_v36, %v1533_v5 }
 0xd27   :  { %v1323_v43 = vmul.f32 %v1319_v14, %v1319_v14  ;;  %v2089_v41 = vpack.c.bf16 %v1526_v26, %v1525_v25 }
 0xd28   :  { %v1322_v44 = vmul.f32 %v1318_v42, %v1318_v42 }
 0xd29   :  { %v1333_v45 = vsel %vm117_vm0, %v1323_v43, 0.0 }
 0xd2a   :  { %1334 = vadd.xlane.f32.xlu1 %v1333_v45  ;;  %v1330_v46 = vsel %vm117_vm0, %v1322_v44, 0.0  ;;  %v1537_v44 = vld [vmem:[%s2912_s8 + $0x60] sm:$0xff]  ;;  %v1538_v45 = vld [vmem:[%s2912_s8 + $0x68] sm:$0xff] }
 0xd2b   :  { %1331 = vadd.xlane.f32.xlu0 %v1330_v46  ;;  %v2107_v46 = vpack.c.bf16 %v1538_v45, %v1537_v44 }
 0xdb0   :  { %v1329_v49 = vpop.xlane.xlu1 %1328 }
 0xdb1   :  { %v1337_v50 = vmul.f32 0.03125, %v1329_v49  ;;  %v1326_v51 = vpop.xlane.xlu0 %1325  ;;  %v1540_v49 = vld [vmem:[%s2912_s8 + $0x78] sm:$0xff] }
 0xdb2   :  { %v1336_v52 = vmul.f32 0.03125, %v1326_v51  ;;  %v1681_v51 = vld [vmem:[%s2914_s10 + $0x2] ss:$0 sm:$0xff] }
 0xdb3   :  { %v1341_v54 = vadd.f32 1e-12, %v1337_v50 }
 0xdb4   :  { %v1340_v55 = vadd.f32 1e-12, %v1336_v52 }
 0xdb5   :  { %2225 = vrsqrt.f32 %v1341_v54 }
 0xdb6   :  { %2227 = vrsqrt.f32 %v1340_v55 }
 0xdb7   :  { %v1335_v56 = vpop.xlane.xlu1 %1334 }
 0xdb8   :  { %v1339_v57 = vmul.f32 0.03125, %v1335_v56  ;;  %v1332_v21 = vpop.xlane.xlu0 %1331 }
 0xdb9   :  { %v1338_v24 = vmul.f32 0.03125, %v1332_v21 }
 0xdba   :  { %v1343_v58 = vadd.f32 1e-12, %v1339_v57 }
 0xdbb   :  { %v1342_v39 = vadd.f32 1e-12, %v1338_v24 }
 0xdbc   :  { %2229 = vrsqrt.f32 %v1343_v58 }
 0xdbd   :  { %2231 = vrsqrt.f32 %v1342_v39 }
 0xdbf   :  { %v2226_v60 = vpop.eup %2225 }
 0xdc0   :  { %v2228_v0 = vpop.eup %2227  ;;  %v1349_v1 = vmul.f32 %v2226_v60, %v1317_v31  ;;  %v2092_v31 = vpack.c.bf16 %v1528_v27, %v1527_v38 }
 0xdc1   :  { %v1348_v3 = vmul.f32 %v2228_v0, %v1316_v32  ;;  %v1529_v32 = vld [vmem:[%s2912_s8 + $0x20] sm:$0xff] }
 0xdc2   :  { %v1357_v33 = vmul.f32 %v1678_v62, %v1349_v1  ;;  %v2095_v10 = vpack.c.bf16 %v1530_v6, %v1529_v32 }
 0xdc3   :  { %v1356_v11 = vmul.f32 %v1678_v62, %v1348_v3 }
 0xdc4   :  { %v1365_v12 = vadd.f32 %v1679_v8, %v1357_v33 }
 0xdc5   :  { %v1364_v29 = vadd.f32 %v1679_v8, %v1356_v11 }
 0xdc6   :  { %v2230_v13 = vpop.eup %2229 }
 0xdc7   :  { %v2232_v59 = vpop.eup %2231  ;;  %v1351_v53 = vmul.f32 %v2230_v13, %v1319_v14  ;;  %v2077_v15 = vpack.c.bf16 %v1365_v12, %v1364_v29  ;;  %v1535_v14 = vld [vmem:[%s2912_s8 + $0x50] sm:$0xff] }
 0xdc8   :  { %v1350_v16 = vmul.f32 %v2232_v59, %v1318_v42  ;;  %v1536_v42 = vld [vmem:[%s2912_s8 + $0x58] sm:$0xff] }
 0xdc9   :  { %2078 = vmatpush3.bf16.msra.mxu0 %v2077_v15  ;;  %v1359_v17 = vmul.f32 %v1678_v62, %v1351_v53  ;;  %v2104_v43 = vpack.c.bf16 %v1536_v42, %v1535_v14 }
 0xdca   :  { %2079 = vmatprep.subr.bf16.mxu0 %v2386_v47  ;;  %v1358_v4 = vmul.f32 %v1678_v62, %v1350_v16 }
 0xdcb   :  { %v1367_v18 = vadd.f32 %v1679_v8, %v1359_v17 }
 0xdcc   :  { %v1366_v2 = vadd.f32 %v1679_v8, %v1358_v4 }
 0xdce   :  { %v2080_v19 = vpack.c.bf16 %v1367_v18, %v1366_v2 }
 0xdd0   :  { %2081 = vmatpush3.bf16.msra.mxu0 %v2080_v19 }
 0xdd1   :  { %2082 = vmatprep.subr.bf16.mxu0 %v2386_v47 }
 0xdd3   :  { %1932 = vmatmul.mubr.msk.f32.vlgmr.msra.gmra.mrb[12].mxu0 %vm117_vm0, %v1368_v61 }
 0xdd4   :  { %2084 = vmatpush3.bf16.msra.mxu0 %v2083_v20  ;;  %1942 = vmatprep.mubr.msk.f32.mxu0 %vm2387_vm3, %v2388_v48 }
 0xdd5   :  { %2085 = vmatprep.subr.bf16.mxu0 %v2386_v47 }
 0xdd8   :  { %2087 = vmatpush3.bf16.msra.mxu0 %v2086_v23 }
 0xdd9   :  { %2088 = vmatprep.subr.bf16.mxu0 %v2386_v47 }
 0xea6   :  { %v1438_v28 = vpop.f32.mrb[12].mxu0 }
 0xea7   :  { %v1933_v30 = vpop.f32.mrb[13].mxu0  ;;  %1943 = vmatmul.mubr.msk.f32.vlgmr.msra.gmra.mrb[14].mxu0 %vm117_vm0, %v1438_v28 }
 0xea8   :  { %2090 = vmatpush3.bf16.msra.mxu0 %v2089_v41  ;;  %1977 = vmatprep.mubr.msk.f32.mxu0 %vm2387_vm3, %v2388_v48  ;;  %v1539_v48 = vld [vmem:[%s2912_s8 + $0x70] sm:$0xff]  ;;  %s2343_s8 = scalar_lea.vmem %s1624_s27, 64 }
 0xea9   :  { %2091 = vmatprep.subr.bf16.mxu0 %v2386_v47  ;;  %v2110_v50 = vpack.c.bf16 %v1540_v49, %v1539_v48  ;;  %p2344_p12 = scmp.ne.s32.totalorder %s1624_s27, %s2343_s8  ;;  %p2349_p0 = scmp.lt.s32.totalorder %s2343_s8, %s2343_s8 }
 0xeab   :  { %p2350_p1 = por %p2349_p0, %p2348_p13 }
 0xeac   :  { %2093 = vmatpush3.bf16.msra.mxu0 %v2092_v31 }
 0xead   :  { %2094 = vmatprep.subr.bf16.mxu0 %v2386_v47  ;;  %p2351_p2 = pnand %p2350_p1, %p2344_p12 }
 0xeb0   :  { %2096 = vmatpush3.bf16.msra.mxu0 %v2095_v10 }
 0xeb1   :  { %2097 = vmatprep.subr.bf16.mxu0 %v2386_v47 }
 0xeb4   :  { %2099 = vmatpush3.bf16.msra.mxu0 %v2098_v40 }
 0xeb5   :  { %2100 = vmatprep.subr.bf16.mxu0 %v2386_v47 }
 0xeb8   :  { %2102 = vmatpush3.bf16.msra.mxu0 %v2101_v37 }
 0xeb9   :  { %2103 = vmatprep.subr.bf16.mxu0 %v2386_v47 }
 0xebc   :  { %2105 = vmatpush3.bf16.msra.mxu0 %v2104_v43 }
 0xebd   :  { %2106 = vmatprep.subr.bf16.mxu0 %v2386_v47 }
 0xec0   :  { %2108 = vmatpush3.bf16.msra.mxu0 %v2107_v46 }
 0xec1   :  { %2109 = vmatprep.subr.bf16.mxu0 %v2386_v47  ;;  %v1683_v47 = vld [vmem:[%s2914_s10 + $0x3] ss:$0 sm:$0xff] }
 0xec4   :  { %2111 = vmatpush3.bf16.msra.mxu0 %v2110_v50 }
 0xf7a   :  { %v1520_v52 = vpop.f32.mrb[14].mxu0 }
 0xf7b   :  { %v1521_v54 = vadd.f32 %v1681_v51, %v1520_v52  ;;  %v1944_v55 = vpop.f32.mrb[15].mxu0 }
 0xf7d   :  { %v1524_v56 = vmax.f32 %v1521_v54, 0.0 }
 0xf7f   :  { %1978 = vmatmul.mubr.f32.vlgmr.msra.gmra.mrb[16].mxu0 %v1524_v56 }
0x1052   :  { %v1612_v57 = vpop.f32.mrb[16].mxu0 }
0x1053   :  { %v1613_v21 = vadd.f32 %v1683_v47, %v1612_v57  ;;  %v1979_v24 = vpop.f32.mrb[17].mxu0 }
0x1055   :  { %1616 = vst [vmem:[#allocation11] sm:$0xf] %v1613_v21 }
0x1056   :  { %2354 = shalt.err (!%p2351_p2)
}
0x1057   :  { %s2355_s3 = scalar_lea.hbm %s2915_s11, 64 }
0x1058   :  { %p2356_p3 = scmp.ne.s32.totalorder %s2915_s11, %s2355_s3  ;;  %p2359_p4 = scmp.lt.u32.totalorder %s2355_s3, %s2915_s11 }
0x105a   :  { %p2361_p5 = pnand %p2359_p4, %p2356_p3 }
0x105c   :  { %2364 = shalt.err (!%p2361_p5)
}
0x105d   :  { %1626 = dma.vmem_to_hbm [thread:$0]  %s1624_s27, 64, %s2915_s11, [#allocation4]  }
0x105e   :  { %2371 = dma.done.wait [#allocation4], 64  }
0x105f   :  { %2372 = vsyncadd [#allocation4], 4294967232 }
0x1060   :  { %1630 = vsyncpa [#allocation3], 1 }
0x1061   :  { %1631 = vsyncpa [#allocation6], 1 }
0x1062   :  { %1632 = vsyncpa [#allocation9], 1 }
0x1063   :  { %1633 = vsyncpa [#allocation4], 1 }

</bundles_post_ra>
